<compile_context>
chip_gen: v6e
topology: v6e:2x2x1
jax: 0.10.0
libtpu: 0.0.40
codegen_flags: <defaults>
</compile_context>

<pallas_src>
import functools
import math

import jax
import jax.numpy as jnp
from jax import lax
from jax.experimental import pallas as pl
from jax.experimental.pallas import tpu as pltpu

MXU_DTYPE = jnp.bfloat16        # matmul operand / activation-stream dtype
_INV_SQRT2 = 0.7071067811865476
_NEG_INF = -1e30


def _fit_tile(dim, target, *, lane=False):
    """Largest 'nice' tile <= target that evenly divides dim.

    lane=True restricts to multiples of 128 (or the full dim) so the last
    block dim is always lane-aligned.  Sublane dims may also use 8.
    """
    if dim <= target:
        return dim
    cands = (1024, 512, 256, 128) if lane else (1024, 512, 256, 128, 8)
    for c in cands:
        if c <= target and dim % c == 0:
            return c
    return dim  # only reachable for small static model dims (full block)


# ---------------------- fused linear (the workhorse kernel) -----------------
#
#   out = [residual +] [layer_scale *] act( LN?(x) @ W + b )
#
# grid = (M/tm, N/tn, K/tk).  When K fits one step (every LN call and all
# small-K calls) the f32 accumulator scratch is skipped.  When LN is fused,
# LN(x) is computed once per row tile (j == 0) into a bf16 VMEM scratch and
# reused for every N tile.

def _fused_linear_kernel(*refs, has_ln, has_gelu, has_scale, has_residual,
                         multi_k, ln_eps):
    it = iter(refs)
    x_ref = next(it)
    w_ref = next(it)
    b_ref = next(it)
    g_ref = next(it) if has_ln else None
    bb_ref = next(it) if has_ln else None
    s_ref = next(it) if has_scale else None
    r_ref = next(it) if has_residual else None
    o_ref = next(it)
    xln_ref = next(it) if has_ln else None
    acc_ref = next(it) if multi_k else None

    def epilogue(y):
        y = y + b_ref[...]
        if has_gelu:
            # exact GELU (matches torch.nn.GELU default)
            y = 0.5 * y * (1.0 + lax.erf(y * _INV_SQRT2))
        if has_scale:
            y = y * s_ref[...]
        if has_residual:
            y = y + r_ref[...].astype(jnp.float32)
        o_ref[...] = y.astype(o_ref.dtype)

    if has_ln:
        # Single K step (tk == K).  Compute LN once per row tile, cache bf16.
        @pl.when(pl.program_id(1) == 0)
        def _():
            x = x_ref[...].astype(jnp.float32)
            mean = jnp.mean(x, axis=-1, keepdims=True)
            var = jnp.mean((x - mean) ** 2, axis=-1, keepdims=True)
            xn = (x - mean) * lax.rsqrt(var + ln_eps)
            xln_ref[...] = (xn * g_ref[...] + bb_ref[...]).astype(xln_ref.dtype)

        y = jnp.dot(xln_ref[...], w_ref[...],
                    preferred_element_type=jnp.float32)
        epilogue(y)
    elif not multi_k:
        y = jnp.dot(x_ref[...].astype(w_ref.dtype), w_ref[...],
                    preferred_element_type=jnp.float32)
        epilogue(y)
    else:
        k = pl.program_id(2)

        @pl.when(k == 0)
        def _():
            acc_ref[...] = jnp.zeros_like(acc_ref)

        acc_ref[...] += jnp.dot(x_ref[...].astype(w_ref.dtype), w_ref[...],
                                preferred_element_type=jnp.float32)

        @pl.when(k == pl.num_programs(2) - 1)
        def _():
            epilogue(acc_ref[...])


def fused_linear(x, w, b, *, ln=None, gelu=False, scale=None, residual=None,
                 ln_eps=1e-6, out_dtype=None, tm=256, tn=256, tk=512):
    """out = [residual +] [scale *] act( LN?(x) @ w + b ).  x:(M,K) w:(K,N)."""
    M, K = x.shape
    Kw, N = w.shape
    assert K == Kw
    has_ln = ln is not None
    has_scale = scale is not None
    has_res = residual is not None
    out_dtype = x.dtype if out_dtype is None else out_dtype

    tm = _fit_tile(M, tm, lane=False)
    tn = _fit_tile(N, tn, lane=True)
    tk = K if has_ln else _fit_tile(K, tk, lane=True)   # LN needs the full row
    multi_k = (K // tk) > 1
    grid = (M // tm, N // tn, K // tk)

    inputs = [x, w.astype(MXU_DTYPE), b.reshape(1, N).astype(jnp.float32)]
    in_specs = [
        pl.BlockSpec((tm, tk), lambda i, j, k: (i, k)),
        pl.BlockSpec((tk, tn), lambda i, j, k: (k, j)),
        pl.BlockSpec((1, tn), lambda i, j, k: (0, j)),
    ]
    if has_ln:
        g, bb = ln
        inputs += [g.reshape(1, K).astype(jnp.float32),
                   bb.reshape(1, K).astype(jnp.float32)]
        in_specs += [pl.BlockSpec((1, tk), lambda i, j, k: (0, k)),
                     pl.BlockSpec((1, tk), lambda i, j, k: (0, k))]
    if has_scale:
        inputs.append(scale.reshape(1, N).astype(jnp.float32))
        in_specs.append(pl.BlockSpec((1, tn), lambda i, j, k: (0, j)))
    if has_res:
        inputs.append(residual)
        in_specs.append(pl.BlockSpec((tm, tn), lambda i, j, k: (i, j)))

    scratch = []
    if has_ln:
        scratch.append(pltpu.VMEM((tm, tk), MXU_DTYPE))     # cached LN(x)
    if multi_k:
        scratch.append(pltpu.VMEM((tm, tn), jnp.float32))   # f32 accumulator

    # With fused LN the LN cache is carried across the N ("j") axis.
    dims = (("parallel", "arbitrary", "arbitrary") if has_ln
            else ("parallel", "parallel", "arbitrary"))

    kernel = functools.partial(_fused_linear_kernel, has_ln=has_ln,
                               has_gelu=gelu, has_scale=has_scale,
                               has_residual=has_res, multi_k=multi_k,
                               ln_eps=ln_eps)
    return pl.pallas_call(
        kernel,
        out_shape=jax.ShapeDtypeStruct((M, N), out_dtype),
        grid=grid,
        in_specs=in_specs,
        out_specs=pl.BlockSpec((tm, tn), lambda i, j, k: (i, j)),
        scratch_shapes=scratch,
        compiler_params=pltpu.CompilerParams(dimension_semantics=dims),
    )(*inputs)


# --------------------------------- layernorm --------------------------------


def _layernorm_kernel(x_ref, g_ref, b_ref, o_ref, *, eps):
    x = x_ref[...].astype(jnp.float32)
    mean = jnp.mean(x, axis=-1, keepdims=True)
    var = jnp.mean((x - mean) ** 2, axis=-1, keepdims=True)
    y = (x - mean) * lax.rsqrt(var + eps)
    o_ref[...] = (y * g_ref[...] + b_ref[...]).astype(o_ref.dtype)


def layernorm(x, gamma, beta, eps=1e-6, tm=512, out_dtype=None):
    M, D = x.shape
    out_dtype = x.dtype if out_dtype is None else out_dtype
    tm = _fit_tile(M, tm, lane=False)
    return pl.pallas_call(
        functools.partial(_layernorm_kernel, eps=eps),
        out_shape=jax.ShapeDtypeStruct((M, D), out_dtype),
        grid=(M // tm,),
        in_specs=[pl.BlockSpec((tm, D), lambda i: (i, 0)),
                  pl.BlockSpec((1, D), lambda i: (0, 0)),
                  pl.BlockSpec((1, D), lambda i: (0, 0))],
        out_specs=pl.BlockSpec((tm, D), lambda i: (i, 0)),
        compiler_params=pltpu.CompilerParams(dimension_semantics=("parallel",)),
    )(x, gamma.reshape(1, D).astype(jnp.float32),
      beta.reshape(1, D).astype(jnp.float32))


# ----------------------- flash-style multi-head attention --------------------
#
# qkv is consumed directly in its (B, T_pad, 3D) layout: Q/K/V per head are
# static column slices inside the kernel, and the output is written lane-dense
# as (B, T_pad, D).  grid = (B, q_tiles, kv_tiles) with online softmax over the
# kv axis; padded kv positions (token padding) are masked.

def _flash_attn_kernel(q_ref, kv_ref, o_ref, m_ref, l_ref, acc_ref, *,
                       num_heads, head_dim, scale, t_valid, tkv, seq_padded):
    j = pl.program_id(2)
    nj = pl.num_programs(2)
    D = num_heads * head_dim

    @pl.when(j == 0)
    def _():
        m_ref[...] = jnp.full_like(m_ref, _NEG_INF)
        l_ref[...] = jnp.zeros_like(l_ref)
        acc_ref[...] = jnp.zeros_like(acc_ref)

    if seq_padded:
        col = lax.broadcasted_iota(jnp.int32, (1, tkv), 1) + j * tkv
        kv_valid = col < t_valid                      # (1, tkv)

    for h in range(num_heads):
        hs = slice(h * head_dim, (h + 1) * head_dim)
        qh = q_ref[0, :, h * head_dim:(h + 1) * head_dim]             # bf16
        kh = kv_ref[0, :, D + h * head_dim:D + (h + 1) * head_dim]    # bf16
        vh = kv_ref[0, :, 2 * D + h * head_dim:2 * D + (h + 1) * head_dim]

        # bf16 MXU operands, f32 accumulation.
        s = lax.dot_general(qh, kh, (((1,), (1,)), ((), ())),
                            preferred_element_type=jnp.float32) * scale
        if seq_padded:
            s = jnp.where(kv_valid, s, _NEG_INF)

        m_prev = m_ref[h]                             # (tq, 1)
        m_new = jnp.maximum(m_prev, jnp.max(s, axis=-1, keepdims=True))
        alpha = jnp.exp(m_prev - m_new)
        p = jnp.exp(s - m_new)
        l_ref[h] = alpha * l_ref[h] + jnp.sum(p, axis=-1, keepdims=True)
        pv = jnp.dot(p.astype(vh.dtype), vh, preferred_element_type=jnp.float32)
        acc_ref[:, hs] = alpha * acc_ref[:, hs] + pv
        m_ref[h] = m_new

    @pl.when(j == nj - 1)
    def _():
        for h in range(num_heads):
            hs = slice(h * head_dim, (h + 1) * head_dim)
            # approx reciprocal uses the EUP slot; small relative error vs exact
            acc_ref[:, hs] = acc_ref[:, hs] * pl.reciprocal(l_ref[h], approx=True)
        o_ref[0] = acc_ref[...].astype(o_ref.dtype)   # single lane-dense store


def attention(qkv, *, num_heads, scale, t_valid, tq=128, tkv=128):
    """qkv: (B, T_pad, 3D) -> out (B, T_pad, D). t_valid = true token count."""
    B, Tp, threeD = qkv.shape
    D = threeD // 3
    hd = D // num_heads
    tq = _fit_tile(Tp, tq, lane=False)
    tkv = _fit_tile(Tp, tkv, lane=False)
    grid = (B, Tp // tq, Tp // tkv)

    kernel = functools.partial(_flash_attn_kernel, num_heads=num_heads,
                               head_dim=hd, scale=scale, t_valid=t_valid,
                               tkv=tkv, seq_padded=(Tp != t_valid))
    return pl.pallas_call(
        kernel,
        out_shape=jax.ShapeDtypeStruct((B, Tp, D), qkv.dtype),
        grid=grid,
        in_specs=[
            # Q rows (re-fetched only when the q-tile index changes).
            pl.BlockSpec((1, tq, threeD), lambda b, i, j: (b, i, 0)),
            # K/V rows per kv tile (Q third of the columns is over-fetched).
            pl.BlockSpec((1, tkv, threeD), lambda b, i, j: (b, j, 0)),
        ],
        out_specs=pl.BlockSpec((1, tq, D), lambda b, i, j: (b, i, 0)),
        scratch_shapes=[pltpu.VMEM((num_heads, tq, 1), jnp.float32),   # m
                        pltpu.VMEM((num_heads, tq, 1), jnp.float32),   # l
                        pltpu.VMEM((tq, D), jnp.float32)],             # acc
        compiler_params=pltpu.CompilerParams(
            dimension_semantics=("parallel", "parallel", "arbitrary")),
    )(qkv, qkv)


# --------------------------- parameter construction -------------------------


def _uniform(key, shape, bound):
    return jax.random.uniform(key, shape, jnp.float32, minval=-bound, maxval=bound)


def init_params(key, *, emb_dim, depth, num_heads, patch, in_ch,
                num_patches, r, mlp_ratio=4):
    D, hid = emb_dim, emb_dim * mlp_ratio
    keys = iter(jax.random.split(key, 64 + 32 * depth))

    def linear_w(k, fan_in, fan_out):
        # torch nn.Linear default init (kaiming_uniform a=sqrt(5) -> U(+-1/sqrt(fan_in)))
        return _uniform(k, (fan_in, fan_out), 1.0 / math.sqrt(fan_in))

    params = {
        "patch_w": linear_w(next(keys), in_ch * patch * patch, D),
        "patch_b": _uniform(next(keys), (D,), 1.0 / math.sqrt(in_ch * patch * patch)),
        "cls_token": 0.02 * jax.random.normal(next(keys), (1, 1, D), jnp.float32),
        "pos_embed": 0.02 * jax.random.normal(next(keys), (1, 1 + num_patches, D),
                                              jnp.float32),
        "norm_g": jnp.ones((D,), jnp.float32),
        "norm_b": jnp.zeros((D,), jnp.float32),
        "blocks": [],
    }
    for _ in range(depth):
        blk = {
            "norm1_g": jnp.ones((D,), jnp.float32),
            "norm1_b": jnp.zeros((D,), jnp.float32),
            "wqkv": linear_w(next(keys), D, 3 * D),
            "bqkv": _uniform(next(keys), (3 * D,), 1.0 / math.sqrt(D)),
            # LoRA A: kaiming_uniform(a=sqrt(5)) == U(+-1/sqrt(D))
            "wa_q": linear_w(next(keys), D, r),
            "wa_v": linear_w(next(keys), D, r),
            # NOTE: the reference zero-inits LoRA B (LoRA branch numerically 0
            # at init); small non-zero values here so the folded path is exercised.
            "wb_q": 0.01 * jax.random.normal(next(keys), (r, D), jnp.float32),
            "wb_v": 0.01 * jax.random.normal(next(keys), (r, D), jnp.float32),
            "proj_w": linear_w(next(keys), D, D),
            "proj_b": _uniform(next(keys), (D,), 1.0 / math.sqrt(D)),
            "ls1": jnp.full((D,), 1e-5, jnp.float32),
            "norm2_g": jnp.ones((D,), jnp.float32),
            "norm2_b": jnp.zeros((D,), jnp.float32),
            "fc1_w": linear_w(next(keys), D, hid),
            "fc1_b": _uniform(next(keys), (hid,), 1.0 / math.sqrt(D)),
            "fc2_w": linear_w(next(keys), hid, D),
            "fc2_b": _uniform(next(keys), (D,), 1.0 / math.sqrt(hid)),
            "ls2": jnp.full((D,), 1e-5, jnp.float32),
        }
        params["blocks"].append(blk)
    return params


def prepare_params(params):
    """One-time prep: fold LoRA into the QKV weight (in f32, x@(Wa@Wb) ==
    (x@Wa)@Wb) and pre-cast all matmul weights to bf16."""
    D = params["patch_w"].shape[1]
    prep = {
        "patch_w": params["patch_w"].astype(MXU_DTYPE),
        "patch_b": params["patch_b"],
        "cls_token": params["cls_token"],
        "pos_embed": params["pos_embed"],
        "norm_g": params["norm_g"],
        "norm_b": params["norm_b"],
        "blocks": [],
    }
    for blk in params["blocks"]:
        dwq = blk["wa_q"] @ blk["wb_q"]           # (D, D) rank-r delta, f32
        dwv = blk["wa_v"] @ blk["wb_v"]
        w_eff = blk["wqkv"] + jnp.concatenate(
            [dwq, jnp.zeros((D, D), dwq.dtype), dwv], axis=1)   # fold in f32
        prep["blocks"].append({
            "norm1_g": blk["norm1_g"], "norm1_b": blk["norm1_b"],
            "wqkv_eff": w_eff.astype(MXU_DTYPE),   # single bf16 cast of the sum
            "bqkv": blk["bqkv"],
            "proj_w": blk["proj_w"].astype(MXU_DTYPE), "proj_b": blk["proj_b"],
            "ls1": blk["ls1"],
            "norm2_g": blk["norm2_g"], "norm2_b": blk["norm2_b"],
            "fc1_w": blk["fc1_w"].astype(MXU_DTYPE), "fc1_b": blk["fc1_b"],
            "fc2_w": blk["fc2_w"].astype(MXU_DTYPE), "fc2_b": blk["fc2_b"],
            "ls2": blk["ls2"],
        })
    return prep


# ------------------------------ forward pass --------------------------------


def forward_features(params, x_nchw, *, patch, num_heads):
    """DINOv2 forward_features with LoRA'd qkv in every block."""
    B, C, H, W = x_nchw.shape
    D = params["patch_w"].shape[1]
    nph, npw = H // patch, W // patch
    n_patches = nph * npw

    # patch embedding: conv(k=stride=patch) == matmul over flattened patches
    # TODO(synk): gather patches via a BlockSpec index_map over (nph, npw) to
    # avoid materializing the im2col transpose in HBM.
    xp = x_nchw.reshape(B, C, nph, patch, npw, patch)
    xp = xp.transpose(0, 2, 4, 1, 3, 5).reshape(B * n_patches, C * patch * patch)
    x = fused_linear(xp, params["patch_w"], params["patch_b"],
                     out_dtype=jnp.float32).reshape(B, n_patches, D)

    # prepend cls token, add positional embedding (no register tokens)
    cls = jnp.broadcast_to(params["cls_token"], (B, 1, D))
    x = jnp.concatenate([cls, x], axis=1) + params["pos_embed"]
    T = x.shape[1]

    # Pad the token axis so every row/tile dim is a multiple of 8 (128 at real
    # sequence lengths) -> no pathological full-M tiles, lane-aligned stores.
    pad_to = 128 if T >= 128 else 8
    Tp = ((T + pad_to - 1) // pad_to) * pad_to
    if Tp != T:
        x = jnp.pad(x, ((0, 0), (0, Tp - T), (0, 0)))

    hd = D // num_heads
    scale = 1.0 / math.sqrt(hd)

    # bf16 activation stream between kernels; all in-kernel math stays f32.
    x2d = x.reshape(B * Tp, D).astype(MXU_DTYPE)
    for blk in params["blocks"]:
        # attention branch: LN1 + (LoRA-folded) QKV fused; flash attention
        # consumes (B, Tp, 3D) directly and emits (B, Tp, D) lane-dense.
        qkv = fused_linear(x2d, blk["wqkv_eff"], blk["bqkv"],
                           ln=(blk["norm1_g"], blk["norm1_b"]))
        a = attention(qkv.reshape(B, Tp, 3 * D), num_heads=num_heads,
                      scale=scale, t_valid=T)
        # attn.proj with layer-scale + residual fused into the epilogue
        x2d = fused_linear(a.reshape(B * Tp, D), blk["proj_w"], blk["proj_b"],
                           scale=blk["ls1"], residual=x2d)

        # MLP branch: LN2 + fc1 + GELU fused; fc2 + layer-scale + residual fused
        h = fused_linear(x2d, blk["fc1_w"], blk["fc1_b"],
                         ln=(blk["norm2_g"], blk["norm2_b"]), gelu=True)
        x2d = fused_linear(h, blk["fc2_w"], blk["fc2_b"],
                           scale=blk["ls2"], residual=x2d)

    x_prenorm = x2d.reshape(B, Tp, D)[:, :T].astype(jnp.float32)
    x_norm = layernorm(x2d, params["norm_g"], params["norm_b"],
                       out_dtype=jnp.float32).reshape(B, Tp, D)[:, :T]
    # TODO(synk): pretrained-checkpoint behaviours (pos-embed interpolation for
    # arbitrary resolutions, masking) are not reproduced in this synthetic encoder.
    return {
        "x_norm_clstoken": x_norm[:, 0],
        "x_norm_regtokens": x_norm[:, 1:1],   # no register tokens
        "x_norm_patchtokens": x_norm[:, 1:],
        "x_prenorm": x_prenorm,
        "masks": None,
    }


# ---------------------------------- main -------------------------------------


if __name__ == "__main__":
    # small DINOv2-style config
    EMB_DIM = 32
    DEPTH = 2
    NUM_HEADS = 4
    PATCH = 8
    IN_CH = 3
    IMG = 16
    R = 3  # LoRA rank (reference default r=3)
    NUM_PATCHES = (IMG // PATCH) ** 2

    root = jax.random.PRNGKey(0)
    k_param, k_x = jax.random.split(root)
    raw_params = init_params(k_param, emb_dim=EMB_DIM, depth=DEPTH,
                             num_heads=NUM_HEADS, patch=PATCH, in_ch=IN_CH,
                             num_patches=NUM_PATCHES, r=R)
    params = prepare_params(raw_params)   # LoRA fold + bf16 casts, once

    x = jax.random.normal(k_x, (2, IN_CH, IMG, IMG), jnp.float32)  # NCHW

    fwd = jax.jit(functools.partial(forward_features, patch=PATCH,
                                    num_heads=NUM_HEADS))
    out = fwd(params, x)
    jax.block_until_ready(out)

    assert out["x_norm_clstoken"].shape == (2, EMB_DIM)
    assert out["x_norm_patchtokens"].shape == (2, NUM_PATCHES, EMB_DIM)
    assert out["x_prenorm"].shape == (2, 1 + NUM_PATCHES, EMB_DIM)
    assert bool(jnp.all(jnp.isfinite(out["x_prenorm"])))
    print("KERNEL_OK")
</pallas_src>

<mosaic_0001>
module attributes {stable_mosaic.version = 11 : i64} {
  func.func @_fused_linear_kernel(%arg0: i32, %arg1: i32, %arg2: i32, %arg3: memref<8x192xf32, #tpu.memory_space<vmem>>, %arg4: memref<192x32xbf16, #tpu.memory_space<vmem>>, %arg5: memref<1x32xf32, #tpu.memory_space<vmem>>, %arg6: memref<8x32xf32, #tpu.memory_space<vmem>>) attributes {dimension_semantics = [#tpu.dimension_semantics<parallel>, #tpu.dimension_semantics<parallel>, #tpu.dimension_semantics<arbitrary>], iteration_bounds = array<i64: 1, 1, 1>, scalar_prefetch = 0 : i64, scratch_operands = 0 : i64, tpu.core_type = #tpu.core_type<tc>, window_params = [{transform_indices = @transform_0, window_bounds = array<i64: 8, 192>}, {transform_indices = @transform_1, window_bounds = array<i64: 192, 32>}, {transform_indices = @transform_2, window_bounds = array<i64: 1, 32>}, {transform_indices = @transform_3, window_bounds = array<i64: 8, 32>}]} {
    %c0 = arith.constant 0 : index
    %c0_0 = arith.constant 0 : index
    %0 = vector.load %arg3[%c0, %c0_0] : memref<8x192xf32, #tpu.memory_space<vmem>>, vector<8x192xf32>
    %1 = arith.truncf %0 : vector<8x192xf32> to vector<8x192xbf16>
    %c0_1 = arith.constant 0 : index
    %c0_2 = arith.constant 0 : index
    %2 = vector.load %arg4[%c0_1, %c0_2] : memref<192x32xbf16, #tpu.memory_space<vmem>>, vector<192x32xbf16>
    %cst = arith.constant dense<0.000000e+00> : vector<8x32xf32>
    %3 = tpu.matmul %1, %2, %cst {dimension_numbers = #tpu.dot_dimension_numbers<[1], [0], [0], [1], [0, 0, 1, 1], [], []>} : vector<8x192xbf16>, vector<192x32xbf16>, vector<8x32xf32> -> vector<8x32xf32>
    %c0_3 = arith.constant 0 : index
    %c0_4 = arith.constant 0 : index
    %4 = vector.load %arg5[%c0_3, %c0_4] : memref<1x32xf32, #tpu.memory_space<vmem>>, vector<1x32xf32>
    %5 = vector.broadcast %4 : vector<1x32xf32> to vector<8x32xf32>
    %6 = arith.addf %3, %5 : vector<8x32xf32>
    %c0_5 = arith.constant 0 : index
    %c0_6 = arith.constant 0 : index
    %7 = vector.load %arg6[%c0_5, %c0_6] : memref<8x32xf32, #tpu.memory_space<vmem>>, vector<8x32xf32>
    tpu.vector_store %arg6[%c0_5, %c0_6], %6 {strides = array<i32>} : memref<8x32xf32, #tpu.memory_space<vmem>>, vector<8x32xf32>,
    return
  }
  func.func @transform_0(%arg0: i32, %arg1: i32, %arg2: i32) -> (i32, i32) {
    %c0_i32 = arith.constant 0 : i32
    return %arg0, %arg2 : i32, i32
  }
  func.func @transform_1(%arg0: i32, %arg1: i32, %arg2: i32) -> (i32, i32) {
    %c0_i32 = arith.constant 0 : i32
    return %arg2, %arg1 : i32, i32
  }
  func.func @transform_2(%arg0: i32, %arg1: i32, %arg2: i32) -> (i32, i32) {
    %c0_i32 = arith.constant 0 : i32
    %c0_i32_0 = arith.constant 0 : i32
    return %c0_i32, %arg1 : i32, i32
  }
  func.func @transform_3(%arg0: i32, %arg1: i32, %arg2: i32) -> (i32, i32) {
    %c0_i32 = arith.constant 0 : i32
    return %arg0, %arg1 : i32, i32
  }
}

module attributes {stable_mosaic.version = 11 : i64} {
  func.func @_fused_linear_kernel(%arg0: i32, %arg1: i32, %arg2: i32, %arg3: memref<16x32xbf16, #tpu.memory_space<vmem>>, %arg4: memref<32x96xbf16, #tpu.memory_space<vmem>>, %arg5: memref<1x96xf32, #tpu.memory_space<vmem>>, %arg6: memref<1x32xf32, #tpu.memory_space<vmem>>, %arg7: memref<1x32xf32, #tpu.memory_space<vmem>>, %arg8: memref<16x96xbf16, #tpu.memory_space<vmem>>, %arg9: memref<16x32xbf16, #tpu.memory_space<vmem>>) attributes {dimension_semantics = [#tpu.dimension_semantics<parallel>, #tpu.dimension_semantics<arbitrary>, #tpu.dimension_semantics<arbitrary>], iteration_bounds = array<i64: 1, 1, 1>, scalar_prefetch = 0 : i64, scratch_operands = 1 : i64, tpu.core_type = #tpu.core_type<tc>, window_params = [{transform_indices = @transform_0, window_bounds = array<i64: 16, 32>}, {transform_indices = @transform_1, window_bounds = array<i64: 32, 96>}, {transform_indices = @transform_2, window_bounds = array<i64: 1, 96>}, {transform_indices = @transform_3, window_bounds = array<i64: 1, 32>}, {transform_indices = @transform_4, window_bounds = array<i64: 1, 32>}, {transform_indices = @transform_5, window_bounds = array<i64: 16, 96>}]} {
    %c0_i32 = arith.constant 0 : i32
    %0 = arith.cmpi eq, %arg1, %c0_i32 : i32
    %1 = arith.extui %0 : i1 to i32
    %c0_i32_0 = arith.constant 0 : i32
    %2 = arith.cmpi ne, %1, %c0_i32_0 : i32
    scf.if %2 {
      %c0_8 = arith.constant 0 : index
      %c0_9 = arith.constant 0 : index
      %11 = vector.load %arg3[%c0_8, %c0_9] : memref<16x32xbf16, #tpu.memory_space<vmem>>, vector<16x32xbf16>
      %12 = arith.extf %11 : vector<16x32xbf16> to vector<16x32xf32>
      %cst_10 = arith.constant dense<0.000000e+00> : vector<16xf32>
      %13 = vector.multi_reduction <add>, %12, %cst_10 [1] : vector<16x32xf32> to vector<16xf32>
      %14 = vector.shape_cast %13 : vector<16xf32> to vector<16x1xf32>
      %cst_11 = arith.constant 3.200000e+01 : f32
      %15 = vector.broadcast %cst_11 : f32 to vector<16x1xf32>
      %16 = arith.divf %14, %15 : vector<16x1xf32>
      %17 = vector.broadcast %16 : vector<16x1xf32> to vector<16x32xf32>
      %18 = arith.subf %12, %17 : vector<16x32xf32>
      %19 = arith.mulf %18, %18 : vector<16x32xf32>
      %cst_12 = arith.constant dense<0.000000e+00> : vector<16xf32>
      %20 = vector.multi_reduction <add>, %19, %cst_12 [1] : vector<16x32xf32> to vector<16xf32>
      %21 = vector.shape_cast %20 : vector<16xf32> to vector<16x1xf32>
      %cst_13 = arith.constant 3.200000e+01 : f32
      %22 = vector.broadcast %cst_13 : f32 to vector<16x1xf32>
      %23 = arith.divf %21, %22 : vector<16x1xf32>
      %24 = vector.broadcast %16 : vector<16x1xf32> to vector<16x32xf32>
      %25 = arith.subf %12, %24 : vector<16x32xf32>
      %cst_14 = arith.constant 9.99999997E-7 : f32
      %26 = vector.broadcast %cst_14 : f32 to vector<16x1xf32>
      %27 = arith.addf %23, %26 : vector<16x1xf32>
      %28 = math.rsqrt %27 : vector<16x1xf32>
      %29 = vector.broadcast %28 : vector<16x1xf32> to vector<16x32xf32>
      %30 = arith.mulf %25, %29 : vector<16x32xf32>
      %c0_15 = arith.constant 0 : index
      %c0_16 = arith.constant 0 : index
      %31 = vector.load %arg6[%c0_15, %c0_16] : memref<1x32xf32, #tpu.memory_space<vmem>>, vector<1x32xf32>
      %32 = vector.broadcast %31 : vector<1x32xf32> to vector<16x32xf32>
      %33 = arith.mulf %30, %32 : vector<16x32xf32>
      %c0_17 = arith.constant 0 : index
      %c0_18 = arith.constant 0 : index
      %34 = vector.load %arg7[%c0_17, %c0_18] : memref<1x32xf32, #tpu.memory_space<vmem>>, vector<1x32xf32>
      %35 = vector.broadcast %34 : vector<1x32xf32> to vector<16x32xf32>
      %36 = arith.addf %33, %35 : vector<16x32xf32>
      %37 = arith.truncf %36 : vector<16x32xf32> to vector<16x32xbf16>
      %c0_19 = arith.constant 0 : index
      %c0_20 = arith.constant 0 : index
      %38 = vector.load %arg9[%c0_19, %c0_20] : memref<16x32xbf16, #tpu.memory_space<vmem>>, vector<16x32xbf16>
      tpu.vector_store %arg9[%c0_19, %c0_20], %37 {strides = array<i32>} : memref<16x32xbf16, #tpu.memory_space<vmem>>, vector<16x32xbf16>,
    } else {
    }
    %c0 = arith.constant 0 : index
    %c0_1 = arith.constant 0 : index
    %3 = vector.load %arg9[%c0, %c0_1] : memref<16x32xbf16, #tpu.memory_space<vmem>>, vector<16x32xbf16>
    %c0_2 = arith.constant 0 : index
    %c0_3 = arith.constant 0 : index
    %4 = vector.load %arg4[%c0_2, %c0_3] : memref<32x96xbf16, #tpu.memory_space<vmem>>, vector<32x96xbf16>
    %cst = arith.constant dense<0.000000e+00> : vector<16x96xf32>
    %5 = tpu.matmul %3, %4, %cst {dimension_numbers = #tpu.dot_dimension_numbers<[1], [0], [0], [1], [0, 0, 1, 1], [], []>} : vector<16x32xbf16>, vector<32x96xbf16>, vector<16x96xf32> -> vector<16x96xf32>
    %c0_4 = arith.constant 0 : index
    %c0_5 = arith.constant 0 : index
    %6 = vector.load %arg5[%c0_4, %c0_5] : memref<1x96xf32, #tpu.memory_space<vmem>>, vector<1x96xf32>
    %7 = vector.broadcast %6 : vector<1x96xf32> to vector<16x96xf32>
    %8 = arith.addf %5, %7 : vector<16x96xf32>
    %9 = arith.truncf %8 : vector<16x96xf32> to vector<16x96xbf16>
    %c0_6 = arith.constant 0 : index
    %c0_7 = arith.constant 0 : index
    %10 = vector.load %arg8[%c0_6, %c0_7] : memref<16x96xbf16, #tpu.memory_space<vmem>>, vector<16x96xbf16>
    tpu.vector_store %arg8[%c0_6, %c0_7], %9 {strides = array<i32>} : memref<16x96xbf16, #tpu.memory_space<vmem>>, vector<16x96xbf16>,
    return
  }
  func.func @transform_0(%arg0: i32, %arg1: i32, %arg2: i32) -> (i32, i32) {
    %c0_i32 = arith.constant 0 : i32
    return %arg0, %arg2 : i32, i32
  }
  func.func @transform_1(%arg0: i32, %arg1: i32, %arg2: i32) -> (i32, i32) {
    %c0_i32 = arith.constant 0 : i32
    return %arg2, %arg1 : i32, i32
  }
  func.func @transform_2(%arg0: i32, %arg1: i32, %arg2: i32) -> (i32, i32) {
    %c0_i32 = arith.constant 0 : i32
    %c0_i32_0 = arith.constant 0 : i32
    return %c0_i32, %arg1 : i32, i32
  }
  func.func @transform_3(%arg0: i32, %arg1: i32, %arg2: i32) -> (i32, i32) {
    %c0_i32 = arith.constant 0 : i32
    %c0_i32_0 = arith.constant 0 : i32
    return %c0_i32, %arg2 : i32, i32
  }
  func.func @transform_4(%arg0: i32, %arg1: i32, %arg2: i32) -> (i32, i32) {
    %c0_i32 = arith.constant 0 : i32
    %c0_i32_0 = arith.constant 0 : i32
    return %c0_i32, %arg2 : i32, i32
  }
  func.func @transform_5(%arg0: i32, %arg1: i32, %arg2: i32) -> (i32, i32) {
    %c0_i32 = arith.constant 0 : i32
    return %arg0, %arg1 : i32, i32
  }
}

module attributes {stable_mosaic.version = 11 : i64} {
  func.func @_fused_linear_kernel(%arg0: i32, %arg1: i32, %arg2: i32, %arg3: memref<16x32xbf16, #tpu.memory_space<vmem>>, %arg4: memref<32x32xbf16, #tpu.memory_space<vmem>>, %arg5: memref<1x32xf32, #tpu.memory_space<vmem>>, %arg6: memref<1x32xf32, #tpu.memory_space<vmem>>, %arg7: memref<16x32xbf16, #tpu.memory_space<vmem>>, %arg8: memref<16x32xbf16, #tpu.memory_space<vmem>>) attributes {dimension_semantics = [#tpu.dimension_semantics<parallel>, #tpu.dimension_semantics<parallel>, #tpu.dimension_semantics<arbitrary>], iteration_bounds = array<i64: 1, 1, 1>, scalar_prefetch = 0 : i64, scratch_operands = 0 : i64, tpu.core_type = #tpu.core_type<tc>, window_params = [{transform_indices = @transform_0, window_bounds = array<i64: 16, 32>}, {transform_indices = @transform_1, window_bounds = array<i64: 32, 32>}, {transform_indices = @transform_2, window_bounds = array<i64: 1, 32>}, {transform_indices = @transform_3, window_bounds = array<i64: 1, 32>}, {transform_indices = @transform_4, window_bounds = array<i64: 16, 32>}, {transform_indices = @transform_5, window_bounds = array<i64: 16, 32>}]} {
    %c0 = arith.constant 0 : index
    %c0_0 = arith.constant 0 : index
    %0 = vector.load %arg3[%c0, %c0_0] : memref<16x32xbf16, #tpu.memory_space<vmem>>, vector<16x32xbf16>
    %c0_1 = arith.constant 0 : index
    %c0_2 = arith.constant 0 : index
    %1 = vector.load %arg4[%c0_1, %c0_2] : memref<32x32xbf16, #tpu.memory_space<vmem>>, vector<32x32xbf16>
    %cst = arith.constant dense<0.000000e+00> : vector<16x32xf32>
    %2 = tpu.matmul %0, %1, %cst {dimension_numbers = #tpu.dot_dimension_numbers<[1], [0], [0], [1], [0, 0, 1, 1], [], []>} : vector<16x32xbf16>, vector<32x32xbf16>, vector<16x32xf32> -> vector<16x32xf32>
    %c0_3 = arith.constant 0 : index
    %c0_4 = arith.constant 0 : index
    %3 = vector.load %arg5[%c0_3, %c0_4] : memref<1x32xf32, #tpu.memory_space<vmem>>, vector<1x32xf32>
    %4 = vector.broadcast %3 : vector<1x32xf32> to vector<16x32xf32>
    %5 = arith.addf %2, %4 : vector<16x32xf32>
    %c0_5 = arith.constant 0 : index
    %c0_6 = arith.constant 0 : index
    %6 = vector.load %arg6[%c0_5, %c0_6] : memref<1x32xf32, #tpu.memory_space<vmem>>, vector<1x32xf32>
    %7 = vector.broadcast %6 : vector<1x32xf32> to vector<16x32xf32>
    %8 = arith.mulf %5, %7 : vector<16x32xf32>
    %c0_7 = arith.constant 0 : index
    %c0_8 = arith.constant 0 : index
    %9 = vector.load %arg7[%c0_7, %c0_8] : memref<16x32xbf16, #tpu.memory_space<vmem>>, vector<16x32xbf16>
    %10 = arith.extf %9 : vector<16x32xbf16> to vector<16x32xf32>
    %11 = arith.addf %8, %10 : vector<16x32xf32>
    %12 = arith.truncf %11 : vector<16x32xf32> to vector<16x32xbf16>
    %c0_9 = arith.constant 0 : index
    %c0_10 = arith.constant 0 : index
    %13 = vector.load %arg8[%c0_9, %c0_10] : memref<16x32xbf16, #tpu.memory_space<vmem>>, vector<16x32xbf16>
    tpu.vector_store %arg8[%c0_9, %c0_10], %12 {strides = array<i32>} : memref<16x32xbf16, #tpu.memory_space<vmem>>, vector<16x32xbf16>,
    return
  }
  func.func @transform_0(%arg0: i32, %arg1: i32, %arg2: i32) -> (i32, i32) {
    %c0_i32 = arith.constant 0 : i32
    return %arg0, %arg2 : i32, i32
  }
  func.func @transform_1(%arg0: i32, %arg1: i32, %arg2: i32) -> (i32, i32) {
    %c0_i32 = arith.constant 0 : i32
    return %arg2, %arg1 : i32, i32
  }
  func.func @transform_2(%arg0: i32, %arg1: i32, %arg2: i32) -> (i32, i32) {
    %c0_i32 = arith.constant 0 : i32
    %c0_i32_0 = arith.constant 0 : i32
    return %c0_i32, %arg1 : i32, i32
  }
  func.func @transform_3(%arg0: i32, %arg1: i32, %arg2: i32) -> (i32, i32) {
    %c0_i32 = arith.constant 0 : i32
    %c0_i32_0 = arith.constant 0 : i32
    return %c0_i32, %arg1 : i32, i32
  }
  func.func @transform_4(%arg0: i32, %arg1: i32, %arg2: i32) -> (i32, i32) {
    %c0_i32 = arith.constant 0 : i32
    return %arg0, %arg1 : i32, i32
  }
  func.func @transform_5(%arg0: i32, %arg1: i32, %arg2: i32) -> (i32, i32) {
    %c0_i32 = arith.constant 0 : i32
    return %arg0, %arg1 : i32, i32
  }
}

module attributes {stable_mosaic.version = 11 : i64} {
  func.func @_flash_attn_kernel(%arg0: i32, %arg1: i32, %arg2: i32, %arg3: memref<1x8x96xbf16, #tpu.memory_space<vmem>>, %arg4: memref<1x8x96xbf16, #tpu.memory_space<vmem>>, %arg5: memref<1x8x32xbf16, #tpu.memory_space<vmem>>, %arg6: memref<4x8x1xf32, #tpu.memory_space<vmem>>, %arg7: memref<4x8x1xf32, #tpu.memory_space<vmem>>, %arg8: memref<8x32xf32, #tpu.memory_space<vmem>>) attributes {dimension_semantics = [#tpu.dimension_semantics<parallel>, #tpu.dimension_semantics<parallel>, #tpu.dimension_semantics<arbitrary>], iteration_bounds = array<i64: 2, 1, 1>, scalar_prefetch = 0 : i64, scratch_operands = 3 : i64, tpu.core_type = #tpu.core_type<tc>, window_params = [{transform_indices = @transform_0, window_bounds = array<i64: 1, 8, 96>}, {transform_indices = @transform_1, window_bounds = array<i64: 1, 8, 96>}, {transform_indices = @transform_2, window_bounds = array<i64: 1, 8, 32>}]} {
    %c0_i32 = arith.constant 0 : i32
    %0 = arith.cmpi eq, %arg2, %c0_i32 : i32
    %1 = arith.extui %0 : i1 to i32
    %c0_i32_0 = arith.constant 0 : i32
    %2 = arith.cmpi ne, %1, %c0_i32_0 : i32
    scf.if %2 {
      %cst_111 = arith.constant -1.000000e+30 : f32
      %180 = vector.broadcast %cst_111 : f32 to vector<4x8x1xf32>
      %c0_112 = arith.constant 0 : index
      %c0_113 = arith.constant 0 : index
      %c0_114 = arith.constant 0 : index
      %181 = vector.load %arg6[%c0_112, %c0_113, %c0_114] : memref<4x8x1xf32, #tpu.memory_space<vmem>>, vector<4x8x1xf32>
      tpu.vector_store %arg6[%c0_112, %c0_113, %c0_114], %180 {strides = array<i32>} : memref<4x8x1xf32, #tpu.memory_space<vmem>>, vector<4x8x1xf32>,
      %cst_115 = arith.constant 0.000000e+00 : f32
      %182 = vector.broadcast %cst_115 : f32 to vector<4x8x1xf32>
      %c0_116 = arith.constant 0 : index
      %c0_117 = arith.constant 0 : index
      %c0_118 = arith.constant 0 : index
      %183 = vector.load %arg7[%c0_116, %c0_117, %c0_118] : memref<4x8x1xf32, #tpu.memory_space<vmem>>, vector<4x8x1xf32>
      tpu.vector_store %arg7[%c0_116, %c0_117, %c0_118], %182 {strides = array<i32>} : memref<4x8x1xf32, #tpu.memory_space<vmem>>, vector<4x8x1xf32>,
      %cst_119 = arith.constant 0.000000e+00 : f32
      %184 = vector.broadcast %cst_119 : f32 to vector<8x32xf32>
      %c0_120 = arith.constant 0 : index
      %c0_121 = arith.constant 0 : index
      %185 = vector.load %arg8[%c0_120, %c0_121] : memref<8x32xf32, #tpu.memory_space<vmem>>, vector<8x32xf32>
      tpu.vector_store %arg8[%c0_120, %c0_121], %184 {strides = array<i32>} : memref<8x32xf32, #tpu.memory_space<vmem>>, vector<8x32xf32>,
    } else {
    }
    %3 = tpu.iota {dimensions = array<i32: 1>} : vector<1x8xi32>
    %c8_i32 = arith.constant 8 : i32
    %4 = arith.muli %arg2, %c8_i32 : i32
    %5 = vector.broadcast %4 : i32 to vector<1x8xi32>
    %6 = arith.addi %3, %5 : vector<1x8xi32>
    %c5_i32 = arith.constant 5 : i32
    %7 = vector.broadcast %c5_i32 : i32 to vector<1x8xi32>
    %8 = arith.cmpi slt, %6, %7 : vector<1x8xi32>
    %c0 = arith.constant 0 : index
    %c0_1 = arith.constant 0 : index
    %c0_2 = arith.constant 0 : index
    %9 = vector.load %arg3[%c0, %c0_1, %c0_2] : memref<1x8x96xbf16, #tpu.memory_space<vmem>>, vector<1x8x8xbf16>
    %10 = vector.shape_cast %9 : vector<1x8x8xbf16> to vector<8x8xbf16>
    %c0_3 = arith.constant 0 : index
    %c0_4 = arith.constant 0 : index
    %c32 = arith.constant 32 : index
    %11 = vector.load %arg4[%c0_3, %c0_4, %c32] : memref<1x8x96xbf16, #tpu.memory_space<vmem>>, vector<1x8x8xbf16>
    %12 = vector.shape_cast %11 : vector<1x8x8xbf16> to vector<8x8xbf16>
    %c0_5 = arith.constant 0 : index
    %c0_6 = arith.constant 0 : index
    %c64 = arith.constant 64 : index
    %13 = vector.load %arg4[%c0_5, %c0_6, %c64] : memref<1x8x96xbf16, #tpu.memory_space<vmem>>, vector<1x8x8xbf16>
    %14 = vector.shape_cast %13 : vector<1x8x8xbf16> to vector<8x8xbf16>
    %cst = arith.constant dense<0.000000e+00> : vector<8x8xf32>
    %15 = tpu.matmul %10, %12, %cst {dimension_numbers = #tpu.dot_dimension_numbers<[1], [1], [0], [0], [0, 0, 1, 0], [], []>} : vector<8x8xbf16>, vector<8x8xbf16>, vector<8x8xf32> -> vector<8x8xf32>
    %cst_7 = arith.constant 0.353553385 : f32
    %16 = vector.broadcast %cst_7 : f32 to vector<8x8xf32>
    %17 = arith.mulf %15, %16 : vector<8x8xf32>
    %cst_8 = arith.constant -1.000000e+30 : f32
    %18 = vector.shape_cast %8 : vector<1x8xi1> to vector<1x8xi1>
    %19 = vector.broadcast %18 : vector<1x8xi1> to vector<8x8xi1>
    %20 = vector.broadcast %cst_8 : f32 to vector<8x8xf32>
    %21 = arith.select %19, %17, %20 : vector<8x8xi1>, vector<8x8xf32>
    %c0_9 = arith.constant 0 : index
    %c0_10 = arith.constant 0 : index
    %c0_11 = arith.constant 0 : index
    %22 = vector.load %arg6[%c0_9, %c0_10, %c0_11] : memref<4x8x1xf32, #tpu.memory_space<vmem>>, vector<1x8x1xf32>
    %23 = vector.shape_cast %22 : vector<1x8x1xf32> to vector<8x1xf32>
    %cst_12 = arith.constant dense<0xFF800000> : vector<8xf32>
    %24 = vector.multi_reduction <maximumf>, %21, %cst_12 [1] : vector<8x8xf32> to vector<8xf32>
    %25 = vector.shape_cast %24 : vector<8xf32> to vector<8x1xf32>
    %26 = arith.maximumf %23, %25 : vector<8x1xf32>
    %27 = arith.subf %23, %26 : vector<8x1xf32>
    %28 = math.exp %27 : vector<8x1xf32>
    %29 = vector.broadcast %26 : vector<8x1xf32> to vector<8x8xf32>
    %30 = arith.subf %21, %29 : vector<8x8xf32>
    %31 = math.exp %30 : vector<8x8xf32>
    %c0_13 = arith.constant 0 : index
    %c0_14 = arith.constant 0 : index
    %c0_15 = arith.constant 0 : index
    %32 = vector.load %arg7[%c0_13, %c0_14, %c0_15] : memref<4x8x1xf32, #tpu.memory_space<vmem>>, vector<1x8x1xf32>
    %33 = vector.shape_cast %32 : vector<1x8x1xf32> to vector<8x1xf32>
    %34 = arith.mulf %28, %33 : vector<8x1xf32>
    %cst_16 = arith.constant dense<0.000000e+00> : vector<8xf32>
    %35 = vector.multi_reduction <add>, %31, %cst_16 [1] : vector<8x8xf32> to vector<8xf32>
    %36 = vector.shape_cast %35 : vector<8xf32> to vector<8x1xf32>
    %37 = arith.addf %34, %36 : vector<8x1xf32>
    %c0_17 = arith.constant 0 : index
    %c0_18 = arith.constant 0 : index
    %c0_19 = arith.constant 0 : index
    %38 = vector.load %arg7[%c0_17, %c0_18, %c0_19] : memref<4x8x1xf32, #tpu.memory_space<vmem>>, vector<1x8x1xf32>
    %39 = vector.shape_cast %38 : vector<1x8x1xf32> to vector<8x1xf32>
    %40 = vector.shape_cast %37 : vector<8x1xf32> to vector<1x8x1xf32>
    tpu.vector_store %arg7[%c0_17, %c0_18, %c0_19], %40 {strides = array<i32>} : memref<4x8x1xf32, #tpu.memory_space<vmem>>, vector<1x8x1xf32>,
    %41 = arith.truncf %31 : vector<8x8xf32> to vector<8x8xbf16>
    %cst_20 = arith.constant dense<0.000000e+00> : vector<8x8xf32>
    %42 = tpu.matmul %41, %14, %cst_20 {dimension_numbers = #tpu.dot_dimension_numbers<[1], [0], [0], [1], [0, 0, 1, 1], [], []>} : vector<8x8xbf16>, vector<8x8xbf16>, vector<8x8xf32> -> vector<8x8xf32>
    %c0_21 = arith.constant 0 : index
    %c0_22 = arith.constant 0 : index
    %43 = vector.load %arg8[%c0_21, %c0_22] : memref<8x32xf32, #tpu.memory_space<vmem>>, vector<8x8xf32>
    %44 = vector.broadcast %28 : vector<8x1xf32> to vector<8x8xf32>
    %45 = arith.mulf %44, %43 : vector<8x8xf32>
    %46 = arith.addf %45, %42 : vector<8x8xf32>
    %c0_23 = arith.constant 0 : index
    %c0_24 = arith.constant 0 : index
    %47 = vector.load %arg8[%c0_23, %c0_24] : memref<8x32xf32, #tpu.memory_space<vmem>>, vector<8x8xf32>
    tpu.vector_store %arg8[%c0_23, %c0_24], %46 {strides = array<i32>} : memref<8x32xf32, #tpu.memory_space<vmem>>, vector<8x8xf32>,
    %c0_25 = arith.constant 0 : index
    %c0_26 = arith.constant 0 : index
    %c0_27 = arith.constant 0 : index
    %48 = vector.load %arg6[%c0_25, %c0_26, %c0_27] : memref<4x8x1xf32, #tpu.memory_space<vmem>>, vector<1x8x1xf32>
    %49 = vector.shape_cast %48 : vector<1x8x1xf32> to vector<8x1xf32>
    %50 = vector.shape_cast %26 : vector<8x1xf32> to vector<1x8x1xf32>
    tpu.vector_store %arg6[%c0_25, %c0_26, %c0_27], %50 {strides = array<i32>} : memref<4x8x1xf32, #tpu.memory_space<vmem>>, vector<1x8x1xf32>,
    %c0_28 = arith.constant 0 : index
    %c0_29 = arith.constant 0 : index
    %c8 = arith.constant 8 : index
    %51 = vector.load %arg3[%c0_28, %c0_29, %c8] : memref<1x8x96xbf16, #tpu.memory_space<vmem>>, vector<1x8x8xbf16>
    %52 = vector.shape_cast %51 : vector<1x8x8xbf16> to vector<8x8xbf16>
    %c0_30 = arith.constant 0 : index
    %c0_31 = arith.constant 0 : index
    %c40 = arith.constant 40 : index
    %53 = vector.load %arg4[%c0_30, %c0_31, %c40] : memref<1x8x96xbf16, #tpu.memory_space<vmem>>, vector<1x8x8xbf16>
    %54 = vector.shape_cast %53 : vector<1x8x8xbf16> to vector<8x8xbf16>
    %c0_32 = arith.constant 0 : index
    %c0_33 = arith.constant 0 : index
    %c72 = arith.constant 72 : index
    %55 = vector.load %arg4[%c0_32, %c0_33, %c72] : memref<1x8x96xbf16, #tpu.memory_space<vmem>>, vector<1x8x8xbf16>
    %56 = vector.shape_cast %55 : vector<1x8x8xbf16> to vector<8x8xbf16>
    %cst_34 = arith.constant dense<0.000000e+00> : vector<8x8xf32>
    %57 = tpu.matmul %52, %54, %cst_34 {dimension_numbers = #tpu.dot_dimension_numbers<[1], [1], [0], [0], [0, 0, 1, 0], [], []>} : vector<8x8xbf16>, vector<8x8xbf16>, vector<8x8xf32> -> vector<8x8xf32>
    %cst_35 = arith.constant 0.353553385 : f32
    %58 = vector.broadcast %cst_35 : f32 to vector<8x8xf32>
    %59 = arith.mulf %57, %58 : vector<8x8xf32>
    %cst_36 = arith.constant -1.000000e+30 : f32
    %60 = vector.shape_cast %8 : vector<1x8xi1> to vector<1x8xi1>
    %61 = vector.broadcast %60 : vector<1x8xi1> to vector<8x8xi1>
    %62 = vector.broadcast %cst_36 : f32 to vector<8x8xf32>
    %63 = arith.select %61, %59, %62 : vector<8x8xi1>, vector<8x8xf32>
    %c1 = arith.constant 1 : index
    %c0_37 = arith.constant 0 : index
    %c0_38 = arith.constant 0 : index
    %64 = vector.load %arg6[%c1, %c0_37, %c0_38] : memref<4x8x1xf32, #tpu.memory_space<vmem>>, vector<1x8x1xf32>
    %65 = vector.shape_cast %64 : vector<1x8x1xf32> to vector<8x1xf32>
    %cst_39 = arith.constant dense<0xFF800000> : vector<8xf32>
    %66 = vector.multi_reduction <maximumf>, %63, %cst_39 [1] : vector<8x8xf32> to vector<8xf32>
    %67 = vector.shape_cast %66 : vector<8xf32> to vector<8x1xf32>
    %68 = arith.maximumf %65, %67 : vector<8x1xf32>
    %69 = arith.subf %65, %68 : vector<8x1xf32>
    %70 = math.exp %69 : vector<8x1xf32>
    %71 = vector.broadcast %68 : vector<8x1xf32> to vector<8x8xf32>
    %72 = arith.subf %63, %71 : vector<8x8xf32>
    %73 = math.exp %72 : vector<8x8xf32>
    %c1_40 = arith.constant 1 : index
    %c0_41 = arith.constant 0 : index
    %c0_42 = arith.constant 0 : index
    %74 = vector.load %arg7[%c1_40, %c0_41, %c0_42] : memref<4x8x1xf32, #tpu.memory_space<vmem>>, vector<1x8x1xf32>
    %75 = vector.shape_cast %74 : vector<1x8x1xf32> to vector<8x1xf32>
    %76 = arith.mulf %70, %75 : vector<8x1xf32>
    %cst_43 = arith.constant dense<0.000000e+00> : vector<8xf32>
    %77 = vector.multi_reduction <add>, %73, %cst_43 [1] : vector<8x8xf32> to vector<8xf32>
    %78 = vector.shape_cast %77 : vector<8xf32> to vector<8x1xf32>
    %79 = arith.addf %76, %78 : vector<8x1xf32>
    %c1_44 = arith.constant 1 : index
    %c0_45 = arith.constant 0 : index
    %c0_46 = arith.constant 0 : index
    %80 = vector.load %arg7[%c1_44, %c0_45, %c0_46] : memref<4x8x1xf32, #tpu.memory_space<vmem>>, vector<1x8x1xf32>
    %81 = vector.shape_cast %80 : vector<1x8x1xf32> to vector<8x1xf32>
    %82 = vector.shape_cast %79 : vector<8x1xf32> to vector<1x8x1xf32>
    tpu.vector_store %arg7[%c1_44, %c0_45, %c0_46], %82 {strides = array<i32>} : memref<4x8x1xf32, #tpu.memory_space<vmem>>, vector<1x8x1xf32>,
    %83 = arith.truncf %73 : vector<8x8xf32> to vector<8x8xbf16>
    %cst_47 = arith.constant dense<0.000000e+00> : vector<8x8xf32>
    %84 = tpu.matmul %83, %56, %cst_47 {dimension_numbers = #tpu.dot_dimension_numbers<[1], [0], [0], [1], [0, 0, 1, 1], [], []>} : vector<8x8xbf16>, vector<8x8xbf16>, vector<8x8xf32> -> vector<8x8xf32>
    %c0_48 = arith.constant 0 : index
    %c8_49 = arith.constant 8 : index
    %85 = vector.load %arg8[%c0_48, %c8_49] : memref<8x32xf32, #tpu.memory_space<vmem>>, vector<8x8xf32>
    %86 = vector.broadcast %70 : vector<8x1xf32> to vector<8x8xf32>
    %87 = arith.mulf %86, %85 : vector<8x8xf32>
    %88 = arith.addf %87, %84 : vector<8x8xf32>
    %c0_50 = arith.constant 0 : index
    %c8_51 = arith.constant 8 : index
    %89 = vector.load %arg8[%c0_50, %c8_51] : memref<8x32xf32, #tpu.memory_space<vmem>>, vector<8x8xf32>
    tpu.vector_store %arg8[%c0_50, %c8_51], %88 {strides = array<i32>} : memref<8x32xf32, #tpu.memory_space<vmem>>, vector<8x8xf32>,
    %c1_52 = arith.constant 1 : index
    %c0_53 = arith.constant 0 : index
    %c0_54 = arith.constant 0 : index
    %90 = vector.load %arg6[%c1_52, %c0_53, %c0_54] : memref<4x8x1xf32, #tpu.memory_space<vmem>>, vector<1x8x1xf32>
    %91 = vector.shape_cast %90 : vector<1x8x1xf32> to vector<8x1xf32>
    %92 = vector.shape_cast %68 : vector<8x1xf32> to vector<1x8x1xf32>
    tpu.vector_store %arg6[%c1_52, %c0_53, %c0_54], %92 {strides = array<i32>} : memref<4x8x1xf32, #tpu.memory_space<vmem>>, vector<1x8x1xf32>,
    %c0_55 = arith.constant 0 : index
    %c0_56 = arith.constant 0 : index
    %c16 = arith.constant 16 : index
    %93 = vector.load %arg3[%c0_55, %c0_56, %c16] : memref<1x8x96xbf16, #tpu.memory_space<vmem>>, vector<1x8x8xbf16>
    %94 = vector.shape_cast %93 : vector<1x8x8xbf16> to vector<8x8xbf16>
    %c0_57 = arith.constant 0 : index
    %c0_58 = arith.constant 0 : index
    %c48 = arith.constant 48 : index
    %95 = vector.load %arg4[%c0_57, %c0_58, %c48] : memref<1x8x96xbf16, #tpu.memory_space<vmem>>, vector<1x8x8xbf16>
    %96 = vector.shape_cast %95 : vector<1x8x8xbf16> to vector<8x8xbf16>
    %c0_59 = arith.constant 0 : index
    %c0_60 = arith.constant 0 : index
    %c80 = arith.constant 80 : index
    %97 = vector.load %arg4[%c0_59, %c0_60, %c80] : memref<1x8x96xbf16, #tpu.memory_space<vmem>>, vector<1x8x8xbf16>
    %98 = vector.shape_cast %97 : vector<1x8x8xbf16> to vector<8x8xbf16>
    %cst_61 = arith.constant dense<0.000000e+00> : vector<8x8xf32>
    %99 = tpu.matmul %94, %96, %cst_61 {dimension_numbers = #tpu.dot_dimension_numbers<[1], [1], [0], [0], [0, 0, 1, 0], [], []>} : vector<8x8xbf16>, vector<8x8xbf16>, vector<8x8xf32> -> vector<8x8xf32>
    %cst_62 = arith.constant 0.353553385 : f32
    %100 = vector.broadcast %cst_62 : f32 to vector<8x8xf32>
    %101 = arith.mulf %99, %100 : vector<8x8xf32>
    %cst_63 = arith.constant -1.000000e+30 : f32
    %102 = vector.shape_cast %8 : vector<1x8xi1> to vector<1x8xi1>
    %103 = vector.broadcast %102 : vector<1x8xi1> to vector<8x8xi1>
    %104 = vector.broadcast %cst_63 : f32 to vector<8x8xf32>
    %105 = arith.select %103, %101, %104 : vector<8x8xi1>, vector<8x8xf32>
    %c2 = arith.constant 2 : index
    %c0_64 = arith.constant 0 : index
    %c0_65 = arith.constant 0 : index
    %106 = vector.load %arg6[%c2, %c0_64, %c0_65] : memref<4x8x1xf32, #tpu.memory_space<vmem>>, vector<1x8x1xf32>
    %107 = vector.shape_cast %106 : vector<1x8x1xf32> to vector<8x1xf32>
    %cst_66 = arith.constant dense<0xFF800000> : vector<8xf32>
    %108 = vector.multi_reduction <maximumf>, %105, %cst_66 [1] : vector<8x8xf32> to vector<8xf32>
    %109 = vector.shape_cast %108 : vector<8xf32> to vector<8x1xf32>
    %110 = arith.maximumf %107, %109 : vector<8x1xf32>
    %111 = arith.subf %107, %110 : vector<8x1xf32>
    %112 = math.exp %111 : vector<8x1xf32>
    %113 = vector.broadcast %110 : vector<8x1xf32> to vector<8x8xf32>
    %114 = arith.subf %105, %113 : vector<8x8xf32>
    %115 = math.exp %114 : vector<8x8xf32>
    %c2_67 = arith.constant 2 : index
    %c0_68 = arith.constant 0 : index
    %c0_69 = arith.constant 0 : index
    %116 = vector.load %arg7[%c2_67, %c0_68, %c0_69] : memref<4x8x1xf32, #tpu.memory_space<vmem>>, vector<1x8x1xf32>
    %117 = vector.shape_cast %116 : vector<1x8x1xf32> to vector<8x1xf32>
    %118 = arith.mulf %112, %117 : vector<8x1xf32>
    %cst_70 = arith.constant dense<0.000000e+00> : vector<8xf32>
    %119 = vector.multi_reduction <add>, %115, %cst_70 [1] : vector<8x8xf32> to vector<8xf32>
    %120 = vector.shape_cast %119 : vector<8xf32> to vector<8x1xf32>
    %121 = arith.addf %118, %120 : vector<8x1xf32>
    %c2_71 = arith.constant 2 : index
    %c0_72 = arith.constant 0 : index
    %c0_73 = arith.constant 0 : index
    %122 = vector.load %arg7[%c2_71, %c0_72, %c0_73] : memref<4x8x1xf32, #tpu.memory_space<vmem>>, vector<1x8x1xf32>
    %123 = vector.shape_cast %122 : vector<1x8x1xf32> to vector<8x1xf32>
    %124 = vector.shape_cast %121 : vector<8x1xf32> to vector<1x8x1xf32>
    tpu.vector_store %arg7[%c2_71, %c0_72, %c0_73], %124 {strides = array<i32>} : memref<4x8x1xf32, #tpu.memory_space<vmem>>, vector<1x8x1xf32>,
    %125 = arith.truncf %115 : vector<8x8xf32> to vector<8x8xbf16>
    %cst_74 = arith.constant dense<0.000000e+00> : vector<8x8xf32>
    %126 = tpu.matmul %125, %98, %cst_74 {dimension_numbers = #tpu.dot_dimension_numbers<[1], [0], [0], [1], [0, 0, 1, 1], [], []>} : vector<8x8xbf16>, vector<8x8xbf16>, vector<8x8xf32> -> vector<8x8xf32>
    %c0_75 = arith.constant 0 : index
    %c16_76 = arith.constant 16 : index
    %127 = vector.load %arg8[%c0_75, %c16_76] : memref<8x32xf32, #tpu.memory_space<vmem>>, vector<8x8xf32>
    %128 = vector.broadcast %112 : vector<8x1xf32> to vector<8x8xf32>
    %129 = arith.mulf %128, %127 : vector<8x8xf32>
    %130 = arith.addf %129, %126 : vector<8x8xf32>
    %c0_77 = arith.constant 0 : index
    %c16_78 = arith.constant 16 : index
    %131 = vector.load %arg8[%c0_77, %c16_78] : memref<8x32xf32, #tpu.memory_space<vmem>>, vector<8x8xf32>
    tpu.vector_store %arg8[%c0_77, %c16_78], %130 {strides = array<i32>} : memref<8x32xf32, #tpu.memory_space<vmem>>, vector<8x8xf32>,
    %c2_79 = arith.constant 2 : index
    %c0_80 = arith.constant 0 : index
    %c0_81 = arith.constant 0 : index
    %132 = vector.load %arg6[%c2_79, %c0_80, %c0_81] : memref<4x8x1xf32, #tpu.memory_space<vmem>>, vector<1x8x1xf32>
    %133 = vector.shape_cast %132 : vector<1x8x1xf32> to vector<8x1xf32>
    %134 = vector.shape_cast %110 : vector<8x1xf32> to vector<1x8x1xf32>
    tpu.vector_store %arg6[%c2_79, %c0_80, %c0_81], %134 {strides = array<i32>} : memref<4x8x1xf32, #tpu.memory_space<vmem>>, vector<1x8x1xf32>,
    %c0_82 = arith.constant 0 : index
    %c0_83 = arith.constant 0 : index
    %c24 = arith.constant 24 : index
    %135 = vector.load %arg3[%c0_82, %c0_83, %c24] : memref<1x8x96xbf16, #tpu.memory_space<vmem>>, vector<1x8x8xbf16>
    %136 = vector.shape_cast %135 : vector<1x8x8xbf16> to vector<8x8xbf16>
    %c0_84 = arith.constant 0 : index
    %c0_85 = arith.constant 0 : index
    %c56 = arith.constant 56 : index
    %137 = vector.load %arg4[%c0_84, %c0_85, %c56] : memref<1x8x96xbf16, #tpu.memory_space<vmem>>, vector<1x8x8xbf16>
    %138 = vector.shape_cast %137 : vector<1x8x8xbf16> to vector<8x8xbf16>
    %c0_86 = arith.constant 0 : index
    %c0_87 = arith.constant 0 : index
    %c88 = arith.constant 88 : index
    %139 = vector.load %arg4[%c0_86, %c0_87, %c88] : memref<1x8x96xbf16, #tpu.memory_space<vmem>>, vector<1x8x8xbf16>
    %140 = vector.shape_cast %139 : vector<1x8x8xbf16> to vector<8x8xbf16>
    %cst_88 = arith.constant dense<0.000000e+00> : vector<8x8xf32>
    %141 = tpu.matmul %136, %138, %cst_88 {dimension_numbers = #tpu.dot_dimension_numbers<[1], [1], [0], [0], [0, 0, 1, 0], [], []>} : vector<8x8xbf16>, vector<8x8xbf16>, vector<8x8xf32> -> vector<8x8xf32>
    %cst_89 = arith.constant 0.353553385 : f32
    %142 = vector.broadcast %cst_89 : f32 to vector<8x8xf32>
    %143 = arith.mulf %141, %142 : vector<8x8xf32>
    %cst_90 = arith.constant -1.000000e+30 : f32
    %144 = vector.shape_cast %8 : vector<1x8xi1> to vector<1x8xi1>
    %145 = vector.broadcast %144 : vector<1x8xi1> to vector<8x8xi1>
    %146 = vector.broadcast %cst_90 : f32 to vector<8x8xf32>
    %147 = arith.select %145, %143, %146 : vector<8x8xi1>, vector<8x8xf32>
    %c3 = arith.constant 3 : index
    %c0_91 = arith.constant 0 : index
    %c0_92 = arith.constant 0 : index
    %148 = vector.load %arg6[%c3, %c0_91, %c0_92] : memref<4x8x1xf32, #tpu.memory_space<vmem>>, vector<1x8x1xf32>
    %149 = vector.shape_cast %148 : vector<1x8x1xf32> to vector<8x1xf32>
    %cst_93 = arith.constant dense<0xFF800000> : vector<8xf32>
    %150 = vector.multi_reduction <maximumf>, %147, %cst_93 [1] : vector<8x8xf32> to vector<8xf32>
    %151 = vector.shape_cast %150 : vector<8xf32> to vector<8x1xf32>
    %152 = arith.maximumf %149, %151 : vector<8x1xf32>
    %153 = arith.subf %149, %152 : vector<8x1xf32>
    %154 = math.exp %153 : vector<8x1xf32>
    %155 = vector.broadcast %152 : vector<8x1xf32> to vector<8x8xf32>
    %156 = arith.subf %147, %155 : vector<8x8xf32>
    %157 = math.exp %156 : vector<8x8xf32>
    %c3_94 = arith.constant 3 : index
    %c0_95 = arith.constant 0 : index
    %c0_96 = arith.constant 0 : index
    %158 = vector.load %arg7[%c3_94, %c0_95, %c0_96] : memref<4x8x1xf32, #tpu.memory_space<vmem>>, vector<1x8x1xf32>
    %159 = vector.shape_cast %158 : vector<1x8x1xf32> to vector<8x1xf32>
    %160 = arith.mulf %154, %159 : vector<8x1xf32>
    %cst_97 = arith.constant dense<0.000000e+00> : vector<8xf32>
    %161 = vector.multi_reduction <add>, %157, %cst_97 [1] : vector<8x8xf32> to vector<8xf32>
    %162 = vector.shape_cast %161 : vector<8xf32> to vector<8x1xf32>
    %163 = arith.addf %160, %162 : vector<8x1xf32>
    %c3_98 = arith.constant 3 : index
    %c0_99 = arith.constant 0 : index
    %c0_100 = arith.constant 0 : index
    %164 = vector.load %arg7[%c3_98, %c0_99, %c0_100] : memref<4x8x1xf32, #tpu.memory_space<vmem>>, vector<1x8x1xf32>
    %165 = vector.shape_cast %164 : vector<1x8x1xf32> to vector<8x1xf32>
    %166 = vector.shape_cast %163 : vector<8x1xf32> to vector<1x8x1xf32>
    tpu.vector_store %arg7[%c3_98, %c0_99, %c0_100], %166 {strides = array<i32>} : memref<4x8x1xf32, #tpu.memory_space<vmem>>, vector<1x8x1xf32>,
    %167 = arith.truncf %157 : vector<8x8xf32> to vector<8x8xbf16>
    %cst_101 = arith.constant dense<0.000000e+00> : vector<8x8xf32>
    %168 = tpu.matmul %167, %140, %cst_101 {dimension_numbers = #tpu.dot_dimension_numbers<[1], [0], [0], [1], [0, 0, 1, 1], [], []>} : vector<8x8xbf16>, vector<8x8xbf16>, vector<8x8xf32> -> vector<8x8xf32>
    %c0_102 = arith.constant 0 : index
    %c24_103 = arith.constant 24 : index
    %169 = vector.load %arg8[%c0_102, %c24_103] : memref<8x32xf32, #tpu.memory_space<vmem>>, vector<8x8xf32>
    %170 = vector.broadcast %154 : vector<8x1xf32> to vector<8x8xf32>
    %171 = arith.mulf %170, %169 : vector<8x8xf32>
    %172 = arith.addf %171, %168 : vector<8x8xf32>
    %c0_104 = arith.constant 0 : index
    %c24_105 = arith.constant 24 : index
    %173 = vector.load %arg8[%c0_104, %c24_105] : memref<8x32xf32, #tpu.memory_space<vmem>>, vector<8x8xf32>
    tpu.vector_store %arg8[%c0_104, %c24_105], %172 {strides = array<i32>} : memref<8x32xf32, #tpu.memory_space<vmem>>, vector<8x8xf32>,
    %c3_106 = arith.constant 3 : index
    %c0_107 = arith.constant 0 : index
    %c0_108 = arith.constant 0 : index
    %174 = vector.load %arg6[%c3_106, %c0_107, %c0_108] : memref<4x8x1xf32, #tpu.memory_space<vmem>>, vector<1x8x1xf32>
    %175 = vector.shape_cast %174 : vector<1x8x1xf32> to vector<8x1xf32>
    %176 = vector.shape_cast %152 : vector<8x1xf32> to vector<1x8x1xf32>
    tpu.vector_store %arg6[%c3_106, %c0_107, %c0_108], %176 {strides = array<i32>} : memref<4x8x1xf32, #tpu.memory_space<vmem>>, vector<1x8x1xf32>,
    %c0_i32_109 = arith.constant 0 : i32
    %177 = arith.cmpi eq, %arg2, %c0_i32_109 : i32
    %178 = arith.extui %177 : i1 to i32
    %c0_i32_110 = arith.constant 0 : i32
    %179 = arith.cmpi ne, %178, %c0_i32_110 : i32
    scf.if %179 {
      %c0_111 = arith.constant 0 : index
      %c0_112 = arith.constant 0 : index
      %180 = vector.load %arg8[%c0_111, %c0_112] : memref<8x32xf32, #tpu.memory_space<vmem>>, vector<8x8xf32>
      %c0_113 = arith.constant 0 : index
      %c0_114 = arith.constant 0 : index
      %c0_115 = arith.constant 0 : index
      %181 = vector.load %arg7[%c0_113, %c0_114, %c0_115] : memref<4x8x1xf32, #tpu.memory_space<vmem>>, vector<1x8x1xf32>
      %182 = vector.shape_cast %181 : vector<1x8x1xf32> to vector<8x1xf32>
      %183 = tpu.reciprocal %182 {approx = true} : vector<8x1xf32> -> vector<8x1xf32>
      %184 = vector.broadcast %183 : vector<8x1xf32> to vector<8x8xf32>
      %185 = arith.mulf %180, %184 : vector<8x8xf32>
      %c0_116 = arith.constant 0 : index
      %c0_117 = arith.constant 0 : index
      %186 = vector.load %arg8[%c0_116, %c0_117] : memref<8x32xf32, #tpu.memory_space<vmem>>, vector<8x8xf32>
      tpu.vector_store %arg8[%c0_116, %c0_117], %185 {strides = array<i32>} : memref<8x32xf32, #tpu.memory_space<vmem>>, vector<8x8xf32>,
      %c0_118 = arith.constant 0 : index
      %c8_119 = arith.constant 8 : index
      %187 = vector.load %arg8[%c0_118, %c8_119] : memref<8x32xf32, #tpu.memory_space<vmem>>, vector<8x8xf32>
      %c1_120 = arith.constant 1 : index
      %c0_121 = arith.constant 0 : index
      %c0_122 = arith.constant 0 : index
      %188 = vector.load %arg7[%c1_120, %c0_121, %c0_122] : memref<4x8x1xf32, #tpu.memory_space<vmem>>, vector<1x8x1xf32>
      %189 = vector.shape_cast %188 : vector<1x8x1xf32> to vector<8x1xf32>
      %190 = tpu.reciprocal %189 {approx = true} : vector<8x1xf32> -> vector<8x1xf32>
      %191 = vector.broadcast %190 : vector<8x1xf32> to vector<8x8xf32>
      %192 = arith.mulf %187, %191 : vector<8x8xf32>
      %c0_123 = arith.constant 0 : index
      %c8_124 = arith.constant 8 : index
      %193 = vector.load %arg8[%c0_123, %c8_124] : memref<8x32xf32, #tpu.memory_space<vmem>>, vector<8x8xf32>
      tpu.vector_store %arg8[%c0_123, %c8_124], %192 {strides = array<i32>} : memref<8x32xf32, #tpu.memory_space<vmem>>, vector<8x8xf32>,
      %c0_125 = arith.constant 0 : index
      %c16_126 = arith.constant 16 : index
      %194 = vector.load %arg8[%c0_125, %c16_126] : memref<8x32xf32, #tpu.memory_space<vmem>>, vector<8x8xf32>
      %c2_127 = arith.constant 2 : index
      %c0_128 = arith.constant 0 : index
      %c0_129 = arith.constant 0 : index
      %195 = vector.load %arg7[%c2_127, %c0_128, %c0_129] : memref<4x8x1xf32, #tpu.memory_space<vmem>>, vector<1x8x1xf32>
      %196 = vector.shape_cast %195 : vector<1x8x1xf32> to vector<8x1xf32>
      %197 = tpu.reciprocal %196 {approx = true} : vector<8x1xf32> -> vector<8x1xf32>
      %198 = vector.broadcast %197 : vector<8x1xf32> to vector<8x8xf32>
      %199 = arith.mulf %194, %198 : vector<8x8xf32>
      %c0_130 = arith.constant 0 : index
      %c16_131 = arith.constant 16 : index
      %200 = vector.load %arg8[%c0_130, %c16_131] : memref<8x32xf32, #tpu.memory_space<vmem>>, vector<8x8xf32>
      tpu.vector_store %arg8[%c0_130, %c16_131], %199 {strides = array<i32>} : memref<8x32xf32, #tpu.memory_space<vmem>>, vector<8x8xf32>,
      %c0_132 = arith.constant 0 : index
      %c24_133 = arith.constant 24 : index
      %201 = vector.load %arg8[%c0_132, %c24_133] : memref<8x32xf32, #tpu.memory_space<vmem>>, vector<8x8xf32>
      %c3_134 = arith.constant 3 : index
      %c0_135 = arith.constant 0 : index
      %c0_136 = arith.constant 0 : index
      %202 = vector.load %arg7[%c3_134, %c0_135, %c0_136] : memref<4x8x1xf32, #tpu.memory_space<vmem>>, vector<1x8x1xf32>
      %203 = vector.shape_cast %202 : vector<1x8x1xf32> to vector<8x1xf32>
      %204 = tpu.reciprocal %203 {approx = true} : vector<8x1xf32> -> vector<8x1xf32>
      %205 = vector.broadcast %204 : vector<8x1xf32> to vector<8x8xf32>
      %206 = arith.mulf %201, %205 : vector<8x8xf32>
      %c0_137 = arith.constant 0 : index
      %c24_138 = arith.constant 24 : index
      %207 = vector.load %arg8[%c0_137, %c24_138] : memref<8x32xf32, #tpu.memory_space<vmem>>, vector<8x8xf32>
      tpu.vector_store %arg8[%c0_137, %c24_138], %206 {strides = array<i32>} : memref<8x32xf32, #tpu.memory_space<vmem>>, vector<8x8xf32>,
      %c0_139 = arith.constant 0 : index
      %c0_140 = arith.constant 0 : index
      %208 = vector.load %arg8[%c0_139, %c0_140] : memref<8x32xf32, #tpu.memory_space<vmem>>, vector<8x32xf32>
      %209 = arith.truncf %208 : vector<8x32xf32> to vector<8x32xbf16>
      %c0_141 = arith.constant 0 : index
      %c0_142 = arith.constant 0 : index
      %c0_143 = arith.constant 0 : index
      %210 = vector.load %arg5[%c0_141, %c0_142, %c0_143] : memref<1x8x32xbf16, #tpu.memory_space<vmem>>, vector<1x8x32xbf16>
      %211 = vector.shape_cast %210 : vector<1x8x32xbf16> to vector<8x32xbf16>
      %212 = vector.shape_cast %209 : vector<8x32xbf16> to vector<1x8x32xbf16>
      tpu.vector_store %arg5[%c0_141, %c0_142, %c0_143], %212 {strides = array<i32>} : memref<1x8x32xbf16, #tpu.memory_space<vmem>>, vector<1x8x32xbf16>,
    } else {
    }
    return
  }
  func.func @transform_0(%arg0: i32, %arg1: i32, %arg2: i32) -> (i32, i32, i32) {
    %c0_i32 = arith.constant 0 : i32
    %c0_i32_0 = arith.constant 0 : i32
    return %arg0, %arg1, %c0_i32 : i32, i32, i32
  }
  func.func @transform_1(%arg0: i32, %arg1: i32, %arg2: i32) -> (i32, i32, i32) {
    %c0_i32 = arith.constant 0 : i32
    %c0_i32_0 = arith.constant 0 : i32
    return %arg0, %arg2, %c0_i32 : i32, i32, i32
  }
  func.func @transform_2(%arg0: i32, %arg1: i32, %arg2: i32) -> (i32, i32, i32) {
    %c0_i32 = arith.constant 0 : i32
    %c0_i32_0 = arith.constant 0 : i32
    return %arg0, %arg1, %c0_i32 : i32, i32, i32
  }
}

module attributes {stable_mosaic.version = 11 : i64} {
  func.func @_fused_linear_kernel(%arg0: i32, %arg1: i32, %arg2: i32, %arg3: memref<16x32xbf16, #tpu.memory_space<vmem>>, %arg4: memref<32x128xbf16, #tpu.memory_space<vmem>>, %arg5: memref<1x128xf32, #tpu.memory_space<vmem>>, %arg6: memref<1x32xf32, #tpu.memory_space<vmem>>, %arg7: memref<1x32xf32, #tpu.memory_space<vmem>>, %arg8: memref<16x128xbf16, #tpu.memory_space<vmem>>, %arg9: memref<16x32xbf16, #tpu.memory_space<vmem>>) attributes {dimension_semantics = [#tpu.dimension_semantics<parallel>, #tpu.dimension_semantics<arbitrary>, #tpu.dimension_semantics<arbitrary>], iteration_bounds = array<i64: 1, 1, 1>, scalar_prefetch = 0 : i64, scratch_operands = 1 : i64, tpu.core_type = #tpu.core_type<tc>, window_params = [{transform_indices = @transform_0, window_bounds = array<i64: 16, 32>}, {transform_indices = @transform_1, window_bounds = array<i64: 32, 128>}, {transform_indices = @transform_2, window_bounds = array<i64: 1, 128>}, {transform_indices = @transform_3, window_bounds = array<i64: 1, 32>}, {transform_indices = @transform_4, window_bounds = array<i64: 1, 32>}, {transform_indices = @transform_5, window_bounds = array<i64: 16, 128>}]} {
    %c0_i32 = arith.constant 0 : i32
    %0 = arith.cmpi eq, %arg1, %c0_i32 : i32
    %1 = arith.extui %0 : i1 to i32
    %c0_i32_0 = arith.constant 0 : i32
    %2 = arith.cmpi ne, %1, %c0_i32_0 : i32
    scf.if %2 {
      %c0_11 = arith.constant 0 : index
      %c0_12 = arith.constant 0 : index
      %19 = vector.load %arg3[%c0_11, %c0_12] : memref<16x32xbf16, #tpu.memory_space<vmem>>, vector<16x32xbf16>
      %20 = arith.extf %19 : vector<16x32xbf16> to vector<16x32xf32>
      %cst_13 = arith.constant dense<0.000000e+00> : vector<16xf32>
      %21 = vector.multi_reduction <add>, %20, %cst_13 [1] : vector<16x32xf32> to vector<16xf32>
      %22 = vector.shape_cast %21 : vector<16xf32> to vector<16x1xf32>
      %cst_14 = arith.constant 3.200000e+01 : f32
      %23 = vector.broadcast %cst_14 : f32 to vector<16x1xf32>
      %24 = arith.divf %22, %23 : vector<16x1xf32>
      %25 = vector.broadcast %24 : vector<16x1xf32> to vector<16x32xf32>
      %26 = arith.subf %20, %25 : vector<16x32xf32>
      %27 = arith.mulf %26, %26 : vector<16x32xf32>
      %cst_15 = arith.constant dense<0.000000e+00> : vector<16xf32>
      %28 = vector.multi_reduction <add>, %27, %cst_15 [1] : vector<16x32xf32> to vector<16xf32>
      %29 = vector.shape_cast %28 : vector<16xf32> to vector<16x1xf32>
      %cst_16 = arith.constant 3.200000e+01 : f32
      %30 = vector.broadcast %cst_16 : f32 to vector<16x1xf32>
      %31 = arith.divf %29, %30 : vector<16x1xf32>
      %32 = vector.broadcast %24 : vector<16x1xf32> to vector<16x32xf32>
      %33 = arith.subf %20, %32 : vector<16x32xf32>
      %cst_17 = arith.constant 9.99999997E-7 : f32
      %34 = vector.broadcast %cst_17 : f32 to vector<16x1xf32>
      %35 = arith.addf %31, %34 : vector<16x1xf32>
      %36 = math.rsqrt %35 : vector<16x1xf32>
      %37 = vector.broadcast %36 : vector<16x1xf32> to vector<16x32xf32>
      %38 = arith.mulf %33, %37 : vector<16x32xf32>
      %c0_18 = arith.constant 0 : index
      %c0_19 = arith.constant 0 : index
      %39 = vector.load %arg6[%c0_18, %c0_19] : memref<1x32xf32, #tpu.memory_space<vmem>>, vector<1x32xf32>
      %40 = vector.broadcast %39 : vector<1x32xf32> to vector<16x32xf32>
      %41 = arith.mulf %38, %40 : vector<16x32xf32>
      %c0_20 = arith.constant 0 : index
      %c0_21 = arith.constant 0 : index
      %42 = vector.load %arg7[%c0_20, %c0_21] : memref<1x32xf32, #tpu.memory_space<vmem>>, vector<1x32xf32>
      %43 = vector.broadcast %42 : vector<1x32xf32> to vector<16x32xf32>
      %44 = arith.addf %41, %43 : vector<16x32xf32>
      %45 = arith.truncf %44 : vector<16x32xf32> to vector<16x32xbf16>
      %c0_22 = arith.constant 0 : index
      %c0_23 = arith.constant 0 : index
      %46 = vector.load %arg9[%c0_22, %c0_23] : memref<16x32xbf16, #tpu.memory_space<vmem>>, vector<16x32xbf16>
      tpu.vector_store %arg9[%c0_22, %c0_23], %45 {strides = array<i32>} : memref<16x32xbf16, #tpu.memory_space<vmem>>, vector<16x32xbf16>,
    } else {
    }
    %c0 = arith.constant 0 : index
    %c0_1 = arith.constant 0 : index
    %3 = vector.load %arg9[%c0, %c0_1] : memref<16x32xbf16, #tpu.memory_space<vmem>>, vector<16x32xbf16>
    %c0_2 = arith.constant 0 : index
    %c0_3 = arith.constant 0 : index
    %4 = vector.load %arg4[%c0_2, %c0_3] : memref<32x128xbf16, #tpu.memory_space<vmem>>, vector<32x128xbf16>
    %cst = arith.constant dense<0.000000e+00> : vector<16x128xf32>
    %5 = tpu.matmul %3, %4, %cst {dimension_numbers = #tpu.dot_dimension_numbers<[1], [0], [0], [1], [0, 0, 1, 1], [], []>} : vector<16x32xbf16>, vector<32x128xbf16>, vector<16x128xf32> -> vector<16x128xf32>
    %c0_4 = arith.constant 0 : index
    %c0_5 = arith.constant 0 : index
    %6 = vector.load %arg5[%c0_4, %c0_5] : memref<1x128xf32, #tpu.memory_space<vmem>>, vector<1x128xf32>
    %7 = vector.broadcast %6 : vector<1x128xf32> to vector<16x128xf32>
    %8 = arith.addf %5, %7 : vector<16x128xf32>
    %cst_6 = arith.constant 5.000000e-01 : f32
    %9 = vector.broadcast %cst_6 : f32 to vector<16x128xf32>
    %10 = arith.mulf %9, %8 : vector<16x128xf32>
    %cst_7 = arith.constant 0.707106769 : f32
    %11 = vector.broadcast %cst_7 : f32 to vector<16x128xf32>
    %12 = arith.mulf %8, %11 : vector<16x128xf32>
    %13 = math.erf %12 : vector<16x128xf32>
    %cst_8 = arith.constant 1.000000e+00 : f32
    %14 = vector.broadcast %cst_8 : f32 to vector<16x128xf32>
    %15 = arith.addf %14, %13 : vector<16x128xf32>
    %16 = arith.mulf %10, %15 : vector<16x128xf32>
    %17 = arith.truncf %16 : vector<16x128xf32> to vector<16x128xbf16>
    %c0_9 = arith.constant 0 : index
    %c0_10 = arith.constant 0 : index
    %18 = vector.load %arg8[%c0_9, %c0_10] : memref<16x128xbf16, #tpu.memory_space<vmem>>, vector<16x128xbf16>
    tpu.vector_store %arg8[%c0_9, %c0_10], %17 {strides = array<i32>} : memref<16x128xbf16, #tpu.memory_space<vmem>>, vector<16x128xbf16>,
    return
  }
  func.func @transform_0(%arg0: i32, %arg1: i32, %arg2: i32) -> (i32, i32) {
    %c0_i32 = arith.constant 0 : i32
    return %arg0, %arg2 : i32, i32
  }
  func.func @transform_1(%arg0: i32, %arg1: i32, %arg2: i32) -> (i32, i32) {
    %c0_i32 = arith.constant 0 : i32
    return %arg2, %arg1 : i32, i32
  }
  func.func @transform_2(%arg0: i32, %arg1: i32, %arg2: i32) -> (i32, i32) {
    %c0_i32 = arith.constant 0 : i32
    %c0_i32_0 = arith.constant 0 : i32
    return %c0_i32, %arg1 : i32, i32
  }
  func.func @transform_3(%arg0: i32, %arg1: i32, %arg2: i32) -> (i32, i32) {
    %c0_i32 = arith.constant 0 : i32
    %c0_i32_0 = arith.constant 0 : i32
    return %c0_i32, %arg2 : i32, i32
  }
  func.func @transform_4(%arg0: i32, %arg1: i32, %arg2: i32) -> (i32, i32) {
    %c0_i32 = arith.constant 0 : i32
    %c0_i32_0 = arith.constant 0 : i32
    return %c0_i32, %arg2 : i32, i32
  }
  func.func @transform_5(%arg0: i32, %arg1: i32, %arg2: i32) -> (i32, i32) {
    %c0_i32 = arith.constant 0 : i32
    return %arg0, %arg1 : i32, i32
  }
}

module attributes {stable_mosaic.version = 11 : i64} {
  func.func @_fused_linear_kernel(%arg0: i32, %arg1: i32, %arg2: i32, %arg3: memref<16x128xbf16, #tpu.memory_space<vmem>>, %arg4: memref<128x32xbf16, #tpu.memory_space<vmem>>, %arg5: memref<1x32xf32, #tpu.memory_space<vmem>>, %arg6: memref<1x32xf32, #tpu.memory_space<vmem>>, %arg7: memref<16x32xbf16, #tpu.memory_space<vmem>>, %arg8: memref<16x32xbf16, #tpu.memory_space<vmem>>) attributes {dimension_semantics = [#tpu.dimension_semantics<parallel>, #tpu.dimension_semantics<parallel>, #tpu.dimension_semantics<arbitrary>], iteration_bounds = array<i64: 1, 1, 1>, scalar_prefetch = 0 : i64, scratch_operands = 0 : i64, tpu.core_type = #tpu.core_type<tc>, window_params = [{transform_indices = @transform_0, window_bounds = array<i64: 16, 128>}, {transform_indices = @transform_1, window_bounds = array<i64: 128, 32>}, {transform_indices = @transform_2, window_bounds = array<i64: 1, 32>}, {transform_indices = @transform_3, window_bounds = array<i64: 1, 32>}, {transform_indices = @transform_4, window_bounds = array<i64: 16, 32>}, {transform_indices = @transform_5, window_bounds = array<i64: 16, 32>}]} {
    %c0 = arith.constant 0 : index
    %c0_0 = arith.constant 0 : index
    %0 = vector.load %arg3[%c0, %c0_0] : memref<16x128xbf16, #tpu.memory_space<vmem>>, vector<16x128xbf16>
    %c0_1 = arith.constant 0 : index
    %c0_2 = arith.constant 0 : index
    %1 = vector.load %arg4[%c0_1, %c0_2] : memref<128x32xbf16, #tpu.memory_space<vmem>>, vector<128x32xbf16>
    %cst = arith.constant dense<0.000000e+00> : vector<16x32xf32>
    %2 = tpu.matmul %0, %1, %cst {dimension_numbers = #tpu.dot_dimension_numbers<[1], [0], [0], [1], [0, 0, 1, 1], [], []>} : vector<16x128xbf16>, vector<128x32xbf16>, vector<16x32xf32> -> vector<16x32xf32>
    %c0_3 = arith.constant 0 : index
    %c0_4 = arith.constant 0 : index
    %3 = vector.load %arg5[%c0_3, %c0_4] : memref<1x32xf32, #tpu.memory_space<vmem>>, vector<1x32xf32>
    %4 = vector.broadcast %3 : vector<1x32xf32> to vector<16x32xf32>
    %5 = arith.addf %2, %4 : vector<16x32xf32>
    %c0_5 = arith.constant 0 : index
    %c0_6 = arith.constant 0 : index
    %6 = vector.load %arg6[%c0_5, %c0_6] : memref<1x32xf32, #tpu.memory_space<vmem>>, vector<1x32xf32>
    %7 = vector.broadcast %6 : vector<1x32xf32> to vector<16x32xf32>
    %8 = arith.mulf %5, %7 : vector<16x32xf32>
    %c0_7 = arith.constant 0 : index
    %c0_8 = arith.constant 0 : index
    %9 = vector.load %arg7[%c0_7, %c0_8] : memref<16x32xbf16, #tpu.memory_space<vmem>>, vector<16x32xbf16>
    %10 = arith.extf %9 : vector<16x32xbf16> to vector<16x32xf32>
    %11 = arith.addf %8, %10 : vector<16x32xf32>
    %12 = arith.truncf %11 : vector<16x32xf32> to vector<16x32xbf16>
    %c0_9 = arith.constant 0 : index
    %c0_10 = arith.constant 0 : index
    %13 = vector.load %arg8[%c0_9, %c0_10] : memref<16x32xbf16, #tpu.memory_space<vmem>>, vector<16x32xbf16>
    tpu.vector_store %arg8[%c0_9, %c0_10], %12 {strides = array<i32>} : memref<16x32xbf16, #tpu.memory_space<vmem>>, vector<16x32xbf16>,
    return
  }
  func.func @transform_0(%arg0: i32, %arg1: i32, %arg2: i32) -> (i32, i32) {
    %c0_i32 = arith.constant 0 : i32
    return %arg0, %arg2 : i32, i32
  }
  func.func @transform_1(%arg0: i32, %arg1: i32, %arg2: i32) -> (i32, i32) {
    %c0_i32 = arith.constant 0 : i32
    return %arg2, %arg1 : i32, i32
  }
  func.func @transform_2(%arg0: i32, %arg1: i32, %arg2: i32) -> (i32, i32) {
    %c0_i32 = arith.constant 0 : i32
    %c0_i32_0 = arith.constant 0 : i32
    return %c0_i32, %arg1 : i32, i32
  }
  func.func @transform_3(%arg0: i32, %arg1: i32, %arg2: i32) -> (i32, i32) {
    %c0_i32 = arith.constant 0 : i32
    %c0_i32_0 = arith.constant 0 : i32
    return %c0_i32, %arg1 : i32, i32
  }
  func.func @transform_4(%arg0: i32, %arg1: i32, %arg2: i32) -> (i32, i32) {
    %c0_i32 = arith.constant 0 : i32
    return %arg0, %arg1 : i32, i32
  }
  func.func @transform_5(%arg0: i32, %arg1: i32, %arg2: i32) -> (i32, i32) {
    %c0_i32 = arith.constant 0 : i32
    return %arg0, %arg1 : i32, i32
  }
}

module attributes {stable_mosaic.version = 11 : i64} {
  func.func @_layernorm_kernel(%arg0: i32, %arg1: memref<16x32xbf16, #tpu.memory_space<vmem>>, %arg2: memref<1x32xf32, #tpu.memory_space<vmem>>, %arg3: memref<1x32xf32, #tpu.memory_space<vmem>>, %arg4: memref<16x32xf32, #tpu.memory_space<vmem>>) attributes {dimension_semantics = [#tpu.dimension_semantics<parallel>], iteration_bounds = array<i64: 1>, scalar_prefetch = 0 : i64, scratch_operands = 0 : i64, tpu.core_type = #tpu.core_type<tc>, window_params = [{transform_indices = @transform_0, window_bounds = array<i64: 16, 32>}, {pipeline_mode = #tpu.pipeline_mode<synchronous>, transform_indices = @transform_1, window_bounds = array<i64: 1, 32>}, {pipeline_mode = #tpu.pipeline_mode<synchronous>, transform_indices = @transform_2, window_bounds = array<i64: 1, 32>}, {transform_indices = @transform_3, window_bounds = array<i64: 16, 32>}]} {
    %c0 = arith.constant 0 : index
    %c0_0 = arith.constant 0 : index
    %0 = vector.load %arg1[%c0, %c0_0] : memref<16x32xbf16, #tpu.memory_space<vmem>>, vector<16x32xbf16>
    %1 = arith.extf %0 : vector<16x32xbf16> to vector<16x32xf32>
    %cst = arith.constant dense<0.000000e+00> : vector<16xf32>
    %2 = vector.multi_reduction <add>, %1, %cst [1] : vector<16x32xf32> to vector<16xf32>
    %3 = vector.shape_cast %2 : vector<16xf32> to vector<16x1xf32>
    %cst_1 = arith.constant 3.200000e+01 : f32
    %4 = vector.broadcast %cst_1 : f32 to vector<16x1xf32>
    %5 = arith.divf %3, %4 : vector<16x1xf32>
    %6 = vector.broadcast %5 : vector<16x1xf32> to vector<16x32xf32>
    %7 = arith.subf %1, %6 : vector<16x32xf32>
    %8 = arith.mulf %7, %7 : vector<16x32xf32>
    %cst_2 = arith.constant dense<0.000000e+00> : vector<16xf32>
    %9 = vector.multi_reduction <add>, %8, %cst_2 [1] : vector<16x32xf32> to vector<16xf32>
    %10 = vector.shape_cast %9 : vector<16xf32> to vector<16x1xf32>
    %cst_3 = arith.constant 3.200000e+01 : f32
    %11 = vector.broadcast %cst_3 : f32 to vector<16x1xf32>
    %12 = arith.divf %10, %11 : vector<16x1xf32>
    %13 = vector.broadcast %5 : vector<16x1xf32> to vector<16x32xf32>
    %14 = arith.subf %1, %13 : vector<16x32xf32>
    %cst_4 = arith.constant 9.99999997E-7 : f32
    %15 = vector.broadcast %cst_4 : f32 to vector<16x1xf32>
    %16 = arith.addf %12, %15 : vector<16x1xf32>
    %17 = math.rsqrt %16 : vector<16x1xf32>
    %18 = vector.broadcast %17 : vector<16x1xf32> to vector<16x32xf32>
    %19 = arith.mulf %14, %18 : vector<16x32xf32>
    %c0_5 = arith.constant 0 : index
    %c0_6 = arith.constant 0 : index
    %20 = vector.load %arg2[%c0_5, %c0_6] : memref<1x32xf32, #tpu.memory_space<vmem>>, vector<1x32xf32>
    %21 = vector.broadcast %20 : vector<1x32xf32> to vector<16x32xf32>
    %22 = arith.mulf %19, %21 : vector<16x32xf32>
    %c0_7 = arith.constant 0 : index
    %c0_8 = arith.constant 0 : index
    %23 = vector.load %arg3[%c0_7, %c0_8] : memref<1x32xf32, #tpu.memory_space<vmem>>, vector<1x32xf32>
    %24 = vector.broadcast %23 : vector<1x32xf32> to vector<16x32xf32>
    %25 = arith.addf %22, %24 : vector<16x32xf32>
    %c0_9 = arith.constant 0 : index
    %c0_10 = arith.constant 0 : index
    %26 = vector.load %arg4[%c0_9, %c0_10] : memref<16x32xf32, #tpu.memory_space<vmem>>, vector<16x32xf32>
    tpu.vector_store %arg4[%c0_9, %c0_10], %25 {strides = array<i32>} : memref<16x32xf32, #tpu.memory_space<vmem>>, vector<16x32xf32>,
    return
  }
  func.func @transform_0(%arg0: i32) -> (i32, i32) {
    %c0_i32 = arith.constant 0 : i32
    %c0_i32_0 = arith.constant 0 : i32
    return %arg0, %c0_i32 : i32, i32
  }
  func.func @transform_1(%arg0: i32) -> (i32, i32) {
    %c0_i32 = arith.constant 0 : i32
    %c0_i32_0 = arith.constant 0 : i32
    %c0_i32_1 = arith.constant 0 : i32
    return %c0_i32, %c0_i32_0 : i32, i32
  }
  func.func @transform_2(%arg0: i32) -> (i32, i32) {
    %c0_i32 = arith.constant 0 : i32
    %c0_i32_0 = arith.constant 0 : i32
    %c0_i32_1 = arith.constant 0 : i32
    return %c0_i32, %c0_i32_0 : i32, i32
  }
  func.func @transform_3(%arg0: i32) -> (i32, i32) {
    %c0_i32 = arith.constant 0 : i32
    %c0_i32_0 = arith.constant 0 : i32
    return %arg0, %c0_i32 : i32, i32
  }
}

</mosaic_0001>

<bundles_post_ra>
// kernel: forward_features.15
= control target key start
LH: loop header
LB: loop body
LE: loop exit
PB: predicated region body
PF: predicated region fallthrough
CT: control target
= control target key end

     0   :  { %v156_v0 = vmov 0.0   ;;  %vm157_vm0 = vmmov 0   ;;  %vm51_vm1 = vcmask 261120   ;;  %vm119_vm2 = vcmask 257024   ;;  %s212_s1 = inlined_call_operand.vmem [shape: bf16[32,32], index: 1, kind: input, shape index: {}]   ;;  %s213_s0 = inlined_call_operand.vmem [shape: bf16[16,32], index: 0, kind: input, shape index: {}]   ;;  %s214_s2 = inlined_call_operand.vmem [shape: f32[1,32], index: 2, kind: input, shape index: {}]   ;;  %s215_s4 = inlined_call_operand.vmem [shape: bf16[16,32], index: 4, kind: input, shape index: {}]   ;;  %s216_s3 = inlined_call_operand.vmem [shape: f32[1,32], index: 3, kind: input, shape index: {}]   ;;  %s217_s5 = inlined_call_operand.vmem [shape: bf16[16,32], index: 5, kind: output, shape index: {}]  }
   0x1   :  { %143 = vmatprep.subr.bf16.mxu0 %v156_v0  ;;  %v153_v1 = vld [vmem:[%s212_s1 + $0x8] sm:$0xff]   ;;  %147 = vmatprep.mubr.msk.bf16.mxu0 %vm157_vm0, %v156_v0  ;;  %v154_v2 = vld [vmem:[%s212_s1] sm:$0xff]  }
   0x2   :  { %144 = vmatpush3.bf16.msra.mxu0 %v153_v1  ;;  %v155_v3 = vld [vmem:[%s213_s0] sm:$0xff]  }
   0x3   :  { %145 = vmatprep.subr.bf16.mxu0 %v156_v0  ;;  %v126_v4 = vld [vmem:[%s214_s2] ss:$0 sm:$0xff] }
   0x4   :  { %v137_v5 = vld [vmem:[%s215_s4] sm:$0xff]  }
   0x5   :  { %v131_v7 = vld [vmem:[%s216_s3] ss:$0 sm:$0xff]  ;;  %v138_v9 = vunpack.c.l.bf16 %v137_v5  ;;  %v139_v15 = vunpack.c.h.bf16 %v137_v5 }
   0x6   :  { %146 = vmatpush3.bf16.msra.mxu0 %v154_v2 }
   0x9   :  { %148 = vmatmul.mubr.msk.bf16.vlgmr.msra.gmra.mxu0 %vm51_vm1, %v155_v3 }
  0xc9   :  { %v89_v6 = vpop.f32.mrf.mxu0 }
  0xca   :  { %v90_v8 = vadd.f32 %v126_v4, %v89_v6 }
  0xcb   :  { %v149_v10 = vpop.f32.mrf.mxu0 }
  0xcc   :  { %v103_v11 = vmul.f32 %v131_v7, %v90_v8 }
  0xcd   :  { %v92_v12 = vpop.f32.mrf.mxu0 }
  0xce   :  { %v109_v13 = vadd.f32 %v138_v9, %v103_v11  ;;  %v93_v14 = vadd.f32 %v126_v4, %v92_v12 }
  0xcf   :  { %v150_v16 = vpop.f32.mrf.mxu0 }
  0xd0   :  { %v134_v17 = vpack.c.bf16 %v109_v13, %v109_v13  ;;  %v104_v18 = vmul.f32 %v131_v7, %v93_v14 }
  0xd2   :  { %120 = vst.msk [vmem:[%s217_s5] sm:$0xf] %vm119_vm2, %v134_v17  ;;  %v110_v19 = vadd.f32 %v139_v15, %v104_v18 }
  0xd4   :  { %v135_v20 = vpack.c.bf16 %v110_v19, %v110_v19 }
  0xd6   :  { %121 = vst.msk [vmem:[%s217_s5 + $0x4] sm:$0xf] %vm119_vm2, %v135_v20 }

// kernel: forward_features.12
= control target key start
LH: loop header
LB: loop body
LE: loop exit
PB: predicated region body
PF: predicated region fallthrough
CT: control target
= control target key end

     0   :  { %v199_v0 = vmov 0   ;;  %vm122_vm0 = vcmask 523264   ;;  %vm166_vm1 = vcmask 261120   ;;  %s268_s1 = inlined_call_operand.vmem [shape: bf16[192,32], index: 1, kind: input, shape index: {}]   ;;  %s269_s0 = inlined_call_operand.vmem [shape: f32[8,192], index: 0, kind: input, shape index: {}]   ;;  %s270_s2 = inlined_call_operand.vmem [shape: f32[1,32], index: 2, kind: input, shape index: {}]   ;;  %s271_s3 = inlined_call_operand.vmem [shape: f32[8,32], index: 3, kind: output, shape index: {}]  }
   0x1   :  { %126 = vmatprep.subr.bf16.mxu0 %v199_v0  ;;  %v187_v1 = vld [vmem:[%s268_s1 + $0x38] sm:$0xff]   ;;  %v188_v2 = vld [vmem:[%s268_s1 + $0x30] sm:$0xff]   ;;  %v189_v3 = vld [vmem:[%s268_s1 + $0x28] sm:$0xff]  }
   0x2   :  { %127 = vmatpush1.bf16.msra.mxu0 %v187_v1  ;;  %v190_v4 = vld [vmem:[%s268_s1 + $0x20] sm:$0xff]   ;;  %v16_v5 = vld [vmem:[%s269_s0 + $0x8] sm:$0xff]  ;;  %v191_v7 = vld [vmem:[%s268_s1 + $0x18] sm:$0xff]  }
   0x3   :  { %128 = vmatprep.subr.bf16.mxu0 %v199_v0  ;;  %v18_v6 = vpack.c.bf16 %v16_v5, %v16_v5  ;;  %v192_v8 = vld [vmem:[%s268_s1 + $0x10] sm:$0xff]   ;;  %v193_v9 = vld [vmem:[%s268_s1 + $0x8] sm:$0xff]   ;;  %v194_v10 = vld [vmem:[%s268_s1] sm:$0xff]  }
   0x4   :  { %v195_v11 = vld [vmem:[%s268_s1 + $0x58] sm:$0xff]   ;;  %v196_v12 = vld [vmem:[%s268_s1 + $0x50] sm:$0xff]   ;;  %v197_v13 = vld [vmem:[%s268_s1 + $0x48] sm:$0xff]  }
   0x5   :  { %185 = vmatprep.mubr.msk.bf16.mxu0 %vm122_vm0, %v18_v6  ;;  %v198_v14 = vld [vmem:[%s268_s1 + $0x40] sm:$0xff]  }
   0x6   :  { %129 = vmatpush1.bf16.msra.mxu0 %v188_v2  ;;  %v15_v15 = vld [vmem:[%s269_s0] sm:$0xff] }
   0x7   :  { %130 = vmatprep.subr.bf16.mxu0 %v199_v0  ;;  %v17_v16 = vpack.c.bf16 %v15_v15, %v15_v15  ;;  %v172_v17 = vld [vmem:[%s270_s2] ss:$0 sm:$0xff] }
   0xa   :  { %131 = vmatpush1.bf16.msra.mxu0 %v189_v3 }
   0xb   :  { %132 = vmatprep.subr.bf16.mxu0 %v199_v0 }
   0xe   :  { %133 = vmatpush1.bf16.msra.mxu0 %v190_v4 }
   0xf   :  { %134 = vmatprep.subr.bf16.mxu0 %v199_v0 }
  0x12   :  { %135 = vmatpush1.bf16.msra.mxu0 %v191_v7 }
  0x13   :  { %136 = vmatprep.subr.bf16.mxu0 %v199_v0 }
  0x16   :  { %137 = vmatpush1.bf16.msra.mxu0 %v192_v8 }
  0x17   :  { %138 = vmatprep.subr.bf16.mxu0 %v199_v0 }
  0x1a   :  { %139 = vmatpush1.bf16.msra.mxu0 %v193_v9 }
  0x1b   :  { %140 = vmatprep.subr.bf16.mxu0 %v199_v0 }
  0x1e   :  { %141 = vmatpush1.bf16.msra.mxu0 %v194_v10 }
  0x1f   :  { %150 = vmatprep.subr.bf16.mxu0 %v199_v0 }
  0x22   :  { %151 = vmatpush2.bf16.msra.mxu0 %v195_v11 }
  0x23   :  { %152 = vmatprep.subr.bf16.mxu0 %v199_v0 }
  0x26   :  { %153 = vmatpush2.bf16.msra.mxu0 %v196_v12 }
  0x27   :  { %154 = vmatprep.subr.bf16.mxu0 %v199_v0 }
  0x2a   :  { %155 = vmatpush2.bf16.msra.mxu0 %v197_v13 }
  0x2b   :  { %156 = vmatprep.subr.bf16.mxu0 %v199_v0 }
  0x2e   :  { %157 = vmatpush2.bf16.msra.mxu0 %v198_v14 }
  0x31   :  { %159 = vmatmul.mubr.bf16.vlgmr.msra.gmra.mxu0 %v17_v16 }
  0xf1   :  { %v160_v18 = vpop.f32.mrf.mxu0 }
  0xf2   :  { %v161_v19 = vadd.f32 %v172_v17, %v160_v18 }
  0xf3   :  { %v162_v20 = vpop.f32.mrf.mxu0 }
  0xf4   :  { %167 = vst.msk [vmem:[%s271_s3] sm:$0xff] %vm166_vm1, %v161_v19 }
  0xf5   :  { %v163_v21 = vpop.f32.mrf.mxu0 }
  0xf7   :  { %v164_v22 = vpop.f32.mrf.mxu0 }

// kernel: forward_features.13
= control target key start
LH: loop header
LB: loop body
LE: loop exit
PB: predicated region body
PF: predicated region fallthrough
CT: control target
= control target key end

     0   :  { %vm29_vm0 = vcmask 261120   ;;  %v215_v16 = vmov 0.0   ;;  %vm216_vm1 = vmmov 0   ;;  %vm83_vm2 = vcmask 257024   ;;  %s276_s0 = inlined_call_operand.vmem [shape: bf16[16,32], index: 0, kind: input, shape index: {}]   ;;  %s277_s1 = inlined_call_operand.vmem [shape: bf16[32,96], index: 1, kind: input, shape index: {}]   ;;  %s278_s3 = inlined_call_operand.vmem [shape: f32[1,32], index: 3, kind: input, shape index: {}]   ;;  %s279_s4 = inlined_call_operand.vmem [shape: f32[1,32], index: 4, kind: input, shape index: {}]   ;;  %s280_s2 = inlined_call_operand.vmem [shape: f32[1,96], index: 2, kind: input, shape index: {}]   ;;  %s281_s5 = inlined_call_operand.vmem [shape: bf16[16,96], index: 5, kind: output, shape index: {}]  }
   0x1   :  { %v192_v0 = vld [vmem:[%s276_s0] sm:$0xff]   ;;  %v208_v15 = vld [vmem:[%s277_s1 + $0x8] sm:$0xff]   ;;  %198 = vmatprep.subr.bf16.mxu0 %v215_v16  ;;  %202 = vmatprep.mubr.msk.bf16.mxu0 %vm216_vm1, %v215_v16  ;;  %vm169_vm3 = vcmask 781312  }
   0x2   :  { %v193_v1 = vunpack.c.l.bf16 %v192_v0  ;;  %v194_v2 = vunpack.c.h.bf16 %v192_v0  ;;  %199 = vmatpush3.bf16.msra.mxu0 %v208_v15  ;;  %v209_v17 = vld [vmem:[%s277_s1] sm:$0xff]  }
   0x3   :  { %200 = vmatprep.subr.bf16.mxu0 %v215_v16  ;;  %v176_v25 = vld [vmem:[%s278_s3] ss:$0 sm:$0xff] }
   0x4   :  { %v30_v3 = vsel %vm29_vm0, %v193_v1, 0.0  ;;  %v33_v4 = vsel %vm29_vm0, %v194_v2, 0.0  ;;  %v177_v27 = vld [vmem:[%s279_s4] ss:$0 sm:$0xff] }
   0x5   :  { %31 = vadd.xlane.f32.xlu0 %v30_v3  ;;  %v180_v37 = vld [vmem:[%s280_s2] ss:$0 sm:$0xff] }
   0x6   :  { %201 = vmatpush3.bf16.msra.mxu0 %v209_v17 }
   0x9   :  { %34 = vadd.xlane.f32.xlu0 %v33_v4 }
  0x8e   :  { %v32_v5 = vpop.xlane.xlu0 %31 }
  0x8f   :  { %v37_v6 = vmul.f32 0.03125, %v32_v5 }
  0x91   :  { %v39_v7 = vsub.f32 %v193_v1, %v37_v6 }
  0x92   :  { %v35_v8 = vpop.xlane.xlu0 %34 }
  0x93   :  { %v38_v9 = vmul.f32 0.03125, %v35_v8  ;;  %v41_v10 = vmul.f32 %v39_v7, %v39_v7 }
  0x95   :  { %v40_v11 = vsub.f32 %v194_v2, %v38_v9  ;;  %v43_v12 = vsel %vm29_vm0, %v41_v10, 0.0 }
  0x96   :  { %44 = vadd.xlane.f32.xlu1 %v43_v12 }
  0x97   :  { %v42_v13 = vmul.f32 %v40_v11, %v40_v11 }
  0x99   :  { %v46_v14 = vsel %vm29_vm0, %v42_v13, 0.0 }
  0x9a   :  { %47 = vadd.xlane.f32.xlu1 %v46_v14 }
 0x11f   :  { %v45_v18 = vpop.xlane.xlu1 %44 }
 0x120   :  { %v49_v19 = vmul.f32 0.03125, %v45_v18 }
 0x122   :  { %v51_v20 = vadd.f32 1e-06, %v49_v19 }
 0x123   :  { %v48_v21 = vpop.xlane.xlu1 %47 }
 0x124   :  { %211 = vrsqrt.f32 %v51_v20  ;;  %v50_v22 = vmul.f32 0.03125, %v48_v21 }
 0x126   :  { %v52_v23 = vadd.f32 1e-06, %v50_v22 }
 0x128   :  { %213 = vrsqrt.f32 %v52_v23 }
 0x131   :  { %v212_v24 = vpop.eup %211 }
 0x132   :  { %v55_v26 = vmul.f32 %v212_v24, %v39_v7 }
 0x134   :  { %v64_v28 = vmul.f32 %v176_v25, %v55_v26 }
 0x135   :  { %v214_v29 = vpop.eup %213 }
 0x136   :  { %v73_v30 = vadd.f32 %v177_v27, %v64_v28  ;;  %v56_v31 = vmul.f32 %v214_v29, %v40_v11 }
 0x138   :  { %v187_v32 = vpack.c.bf16 %v73_v30, %v73_v30  ;;  %v65_v33 = vmul.f32 %v176_v25, %v56_v31 }
 0x13a   :  { %84 = vst.msk [vmem:[#allocation2] sm:$0xf] %vm83_vm2, %v187_v32  ;;  %v74_v34 = vadd.f32 %v177_v27, %v65_v33 }
 0x13c   :  { %v188_v35 = vpack.c.bf16 %v74_v34, %v74_v34 }
 0x13e   :  { %85 = vst.msk [vmem:[#allocation2 + $0x4] sm:$0xf] %vm83_vm2, %v188_v35 }
 0x145   :  { %v210_v36 = vld [vmem:[#allocation2] sm:$0xff]  }
 0x146   :  { %203 = vmatmul.mubr.msk.bf16.vlgmr.msra.gmra.mxu0 %vm29_vm0, %v210_v36 }
 0x206   :  { %v154_v38 = vpop.f32.mrf.mxu0 }
 0x207   :  { %v155_v39 = vadd.f32 %v180_v37, %v154_v38 }
 0x208   :  { %v204_v40 = vpop.f32.mrf.mxu0 }
 0x209   :  { %v189_v41 = vpack.c.bf16 %v155_v39, %v155_v39 }
 0x20a   :  { %v157_v42 = vpop.f32.mrf.mxu0 }
 0x20b   :  { %170 = vst.msk [vmem:[%s281_s5] sm:$0xf] %vm169_vm3, %v189_v41  ;;  %v158_v43 = vadd.f32 %v180_v37, %v157_v42 }
 0x20c   :  { %v205_v44 = vpop.f32.mrf.mxu0 }
 0x20d   :  { %v190_v45 = vpack.c.bf16 %v158_v43, %v158_v43 }
 0x20f   :  { %171 = vst.msk [vmem:[%s281_s5 + $0x4] sm:$0xf] %vm169_vm3, %v190_v45 }

// kernel: forward_features.14
= control target key start
LH: loop header
LB: loop body
LE: loop exit
PB: predicated region body
PF: predicated region fallthrough
CT: control target
= control target key end

     0   :  { %s1176_s9 = smov 0   ;;  %s1178_s10 = smov 0   ;;  %s1382_s0 = inlined_call_operand.vmem [shape: bf16[2,8,96], index: 0, kind: input, shape index: {}, may-alias: {0,1}]   ;;  %s1383_s1 = inlined_call_operand.vmem [shape: bf16[2,8,96], index: 1, kind: input, shape index: {}, may-alias: {0,1}]   ;;  %s1384_s2 = inlined_call_operand.vmem [shape: bf16[2,8,32], index: 2, kind: output, shape index: {}]  }
   0x1   :  { %s1180_s11 = smov 0  }
   0x2 LB: > { %s31_s12 = sadd.s32 1, %s1137_s10  ;;  %p959_p0 = scmp.ge.s32.totalorder %s1141_s11, 1  ;;  %s1141_s11 = sphi %s1180_s11, %s12_s11   ;;  %s1137_s10 = sphi %s1178_s10, %s1386_s10   ;;  %s1133_s9 = sphi %s1176_s9, %s1385_s9  }
   0x3   : > { %p33_p1 = scmp.ge.s32.totalorder %s31_s12, 2  ;;  %p151_p2 = scmp.lt.s32.totalorder %s1141_s11, 3 }
   0x5   : > { %s1388_s12 = smov (%p33_p1, %s31_s12), 0  ;;  %p152_p3 = pnand %p959_p0, %p151_p2 }
   0x6   : > { %p184_p4 = scmp.lt.s32.totalorder (!%p152_p3), %s1133_s9, 1  ;;  %s1145_s20 = smov (!%p152_p3), 96  }
   0x7   : > { %155 = sbr.rel (%p152_p3) target bundleno = 1497 (0x5d9), region = 28  ;;  %s1148_s21 = smov (!%p152_p3), 64  }
   0x8   : > { %s1149_s22 = smov (!%p152_p3), 88   ;;  %s1150_s23 = smov (!%p152_p3), 120  }
   0x9   : > { %s1151_s24 = smov (!%p152_p3), 80   ;;  %s1152_s25 = smov (!%p152_p3), 112  }
   0xa   : > { %s1153_s26 = smov (!%p152_p3), 72   ;;  %s1154_s27 = smov (!%p152_p3), 104  }
   0xb   : > { %s1155_s28 = smov (!%p152_p3), 56   ;;  %s1156_s29 = smov (!%p152_p3), 48  }
   0xc   : > { %v1143_v0 = vmov 0.0   ;;  %vm1144_vm0 = vmmov 0   ;;  %s1390_s9 = smov (!%p184_p4, %s1133_s9), 1  ;;  %vm234_vm1 = vcmask 64512   ;;  %vm210_vm2 = vcmask 7168   ;;  %s1157_s30 = smov 40  }
   0xd   : > { %996 = vmatprep.subr.bf16.mxu0 %v1143_v0  ;;  %998 = vmatprep.mubr.msk.bf16.mxu0 %vm1144_vm0, %v1143_v0  ;;  %s1200_s13 = sshll.u32 %s1390_s9, 2  ;;  %v1146_v5 = vmov -1e+30   ;;  %215 = vst.msk [vmem:[#allocation3] sm:$0xff] %vm210_vm2, %v1143_v0  ;;  %216 = vst.msk [vmem:[#allocation3 + $0x8] sm:$0xff] %vm210_vm2, %v1143_v0  ;;  %v221_v6 = vlaneseq  ;;  %v1147_v15 = vmov 0  }
   0xe   : > { %1002 = vmatprep.subr.bf16.mxu1 %v1143_v0  ;;  %1004 = vmatprep.mubr.msk.bf16.mxu1 %vm1144_vm0, %v1143_v0  ;;  %s1206_s16 = scalar_lea.vmem %s1383_s1, %s1200_s13  ;;  %s1213_s19 = scalar_lea.vmem %s1382_s0, %s1200_s13  ;;  %211 = vst.msk [vmem:[#allocation2] sm:$0xff] %vm210_vm2, %v1146_v5  ;;  %212 = vst.msk [vmem:[#allocation2 + $0x8] sm:$0xff] %vm210_vm2, %v1146_v5  ;;  %vm315_vm4 = vcmask 1043456   ;;  %vm219_vm5 = vcmask 261120   ;;  %vm515_vm6 = vcmask 130112   ;;  %vm664_vm7 = vcmask 195712  }
   0xf   : > { %v1088_v1 = vld [vmem:[%s1206_s16] ss:$0 sps:$4 sm:$0xff]   ;;  %213 = vst.msk [vmem:[#allocation2 + $0x10] sm:$0xff] %vm210_vm2, %v1146_v5  ;;  %214 = vst.msk [vmem:[#allocation2 + $0x18] sm:$0xff] %vm210_vm2, %v1146_v5  ;;  %v1233_v7 = vand.u32 127, %v221_v6  ;;  %1086 = vset.pattern.permute.xlu1 %v1147_v15  ;;  %1087 = vset.pattern.permute.xlu0 %v1147_v15  ;;  %s1158_s3 = smov 8   ;;  %s204_s8 = scalar_lea.vmem %s1384_s2, %s1200_s13 }
  0x10   : > { %232 = vrot.lane.b32.xlu0 %v1088_v1, %s1145_s20  ;;  %v227_v4 = vld [vmem:[%s1213_s19] sm:$0xf]  ;;  %217 = vst.msk [vmem:[#allocation3 + $0x10] sm:$0xff] %vm210_vm2, %v1143_v0  ;;  %218 = vst.msk [vmem:[#allocation3 + $0x18] sm:$0xff] %vm210_vm2, %v1143_v0  ;;  %s1159_s4 = smov 16   ;;  %s1160_s5 = smov 24  }
  0x11   : > { %vm226_vm3 = vcmp.lt.s32.totalorder %v1233_v7, 5  ;;  %v1250_v20 = vld [vmem:[%s1206_s16] ss:$0 sps:$4 sm:$0xff]   ;;  %220 = vst.msk [vmem:[#allocation4] sm:$0xff] %vm219_vm5, %v1143_v0  ;;  %vm813_vm8 = vcmask 261312   ;;  %vm861_vm9 = vcmask 257024  }
  0x12   : > { %v1090_v21 = vld [vmem:[%s1213_s19] ss:$0 sps:$4 sm:$0xff]  }
  0x13   : > { %v1255_v22 = vld [vmem:[%s1206_s16] ss:$0 sps:$4 sm:$0xff]  }
  0x14   : > { %v1092_v23 = vld [vmem:[%s1213_s19] ss:$0 sps:$4 sm:$0xff]  }
  0x15   : > { %v1239_v16 = vld [vmem:[#allocation2] sm:$0xff] }
  0x16   : > { %v1260_v24 = vld [vmem:[%s1206_s16] ss:$0 sps:$4 sm:$0xff]   ;;  %v1306_v7 = vld [vmem:[#allocation2 + $0x10] sm:$0xff] }
  0x17   : > { %v1094_v25 = vld [vmem:[%s1213_s19] ss:$0 sps:$4 sm:$0xff]  }
  0x82   : > { %v233_v2 = vpop.permute.xlu0 %232 }
  0x83   : > { %v239_v3 = vsel %vm234_vm1, %v233_v2, 0 }
  0x84   : > { %997 = vmatpush3.bf16.xpose.msra.mxu0 %v239_v3 }
  0x85   : > { %1014 = vmatprep.subr.bf16.mxu0 %v1143_v0 }
  0x8b   : > { %999 = vmatmul.mubr.msk.bf16.vlgmr.msra.gmra.mxu0 %vm234_vm1, %v227_v4  ;;  %v1296_v4 = vld [vmem:[#allocation2 + $0x8] sm:$0xff] }
  0x8c   : > { %1016 = vmatprep.mubr.msk.bf16.mxu0 %vm1144_vm0, %v1143_v0 }
 0x14b   : > { %v275_v8 = vpop.f32.mrf.mxu0 }
 0x14c   : > { %v281_v9 = vmul.f32 0.35355338, %v275_v8 }
 0x14d   : > { %v1000_v10 = vpop.f32.mrf.mxu0 }
 0x14e   : > { %v284_v11 = vsel %vm226_vm3, %v281_v9, -1e+30 }
 0x14f   : > { %v278_v12 = vpop.f32.mrf.mxu0  ;;  %v286_v13 = vsel %vm234_vm1, %v284_v11, -inf }
 0x150   : > { %287 = vmax.xlane.f32.xlu0 %v286_v13  ;;  %v1316_v12 = vld [vmem:[#allocation2 + $0x18] sm:$0xff] }
 0x151   : > { %v1001_v14 = vpop.f32.mrf.mxu0 }
 0x1d9   : > { %v288_v17 = vpop.xlane.xlu0 %287 }
 0x1da   : > { %v1242_v18 = vmax.f32 %v1239_v16, %v288_v17 }
 0x1dc   : > { %v290_v19 = vsub.f32 %v1239_v16, %v1242_v18  ;;  %368 = vst.msk [vmem:[#allocation2] sm:$0xff] %vm210_vm2, %v1242_v18  ;;  %295 = vperm.xlu1 %1086, %v1242_v18  }
 0x1e0   : > { %310 = vrot.lane.b32.xlu1 %v1088_v1, %s1148_s21 }
 0x1e4   : > { %379 = vrot.lane.b32.xlu1 %v1250_v20, %s1149_s22 }
 0x1e8   : > { %374 = vrot.lane.b32.xlu1 %v1090_v21, %s1150_s23 }
 0x1ec   : > { %528 = vrot.lane.b32.xlu1 %v1255_v22, %s1151_s24 }
 0x1f0   : > { %523 = vrot.lane.b32.xlu1 %v1092_v23, %s1152_s25 }
 0x1f4   : > { %677 = vrot.lane.b32.xlu1 %v1260_v24, %s1153_s26 }
 0x1f8   : > { %672 = vrot.lane.b32.xlu1 %v1094_v25, %s1154_s27 }
 0x257   : > { %v296_v26 = vpop.permute.xlu1 %295 }
 0x258   : > { %v298_v27 = vsub.f32 %v284_v11, %v296_v26 }
 0x25a   : > { %v299_v28 = vmul.f32 1.442695, %v298_v27 }
 0x25b   : > { %v311_v29 = vpop.permute.xlu1 %310 }
 0x25c   : > { %1095 = vpow2.f32 %v299_v28  ;;  %v317_v30 = vsel %vm315_vm4, %v311_v29, 0 }
 0x25d   : > { %1003 = vmatpush3.bf16.msra.mxu1 %v317_v30 }
 0x25e   : > { %1008 = vmatprep.subr.bf16.mxu1 %v1143_v0 }
 0x25f   : > { %v380_v31 = vpop.permute.xlu1 %379 }
 0x260   : > { %v385_v34 = vsel %vm234_vm1, %v380_v31, 0 }
 0x263   : > { %v375_v32 = vpop.permute.xlu1 %374 }
 0x267   : > { %v529_v36 = vpop.permute.xlu1 %528 }
 0x268   : > { %v534_v38 = vsel %vm234_vm1, %v529_v36, 0  ;;  %v291_v36 = vmul.f32 1.442695, %v290_v19 }
 0x269   : > { %v1266_v33 = vpop.eup %1095 }
 0x26a   : > { %v309_v35 = vpack.c.bf16 %v1266_v33, %v1266_v33  ;;  %v303_v17 = vsel %vm234_vm1, %v1266_v33, 0.0 }
 0x26b   : > { %v524_v37 = vpop.permute.xlu1 %523 }
 0x26c   : > { %1005 = vmatmul.mubr.msk.bf16.vlgmr.msra.gmra.mxu1 %vm234_vm1, %v309_v35 }
 0x26d   : > { %1009 = vmatpush3.bf16.xpose.msra.mxu1 %v385_v34  ;;  %1010 = vmatprep.mubr.msk.bf16.mxu1 %vm1144_vm0, %v1143_v0 }
 0x26e   : > { %1020 = vmatprep.subr.bf16.mxu1 %v1143_v0 }
 0x26f   : > { %v678_v39 = vpop.permute.xlu1 %677 }
 0x270   : > { %v683_v40 = vsel %vm234_vm1, %v678_v39, 0 }
 0x273   : > { %v673_v41 = vpop.permute.xlu1 %672 }
 0x274   : > { %1011 = vmatmul.mubr.msk.bf16.vlgmr.msra.gmra.mxu1 %vm234_vm1, %v375_v32 }
 0x275   : > { %1021 = vmatpush3.bf16.xpose.msra.mxu1 %v534_v38  ;;  %1022 = vmatprep.mubr.msk.bf16.mxu1 %vm1144_vm0, %v1143_v0 }
 0x276   : > { %1032 = vmatprep.subr.bf16.mxu1 %v1143_v0 }
 0x27c   : > { %1023 = vmatmul.mubr.msk.bf16.vlgmr.msra.gmra.mxu1 %vm234_vm1, %v524_v37 }
 0x27d   : > { %1033 = vmatpush3.bf16.xpose.msra.mxu1 %v683_v40  ;;  %1034 = vmatprep.mubr.msk.bf16.mxu1 %vm1144_vm0, %v1143_v0 }
 0x284   : > { %1035 = vmatmul.mubr.msk.bf16.vlgmr.msra.gmra.mxu1 %vm234_vm1, %v673_v41 }
 0x32c   : > { %v1285_v42 = vpop.f32.mrf.mxu1 }
 0x32e   : > { %v1006_v43 = vpop.f32.mrf.mxu1 }
 0x330   : > { %v356_v44 = vpop.f32.mrf.mxu1 }
 0x332   : > { %v1007_v45 = vpop.f32.mrf.mxu1 }
 0x334   : > { %v421_v46 = vpop.f32.mrf.mxu1 }
 0x335   : > { %v427_v47 = vmul.f32 0.35355338, %v421_v46  ;;  %v301_v46 = vld [vmem:[#allocation3] sm:$0xff] }
 0x336   : > { %v1012_v48 = vpop.f32.mrf.mxu1 }
 0x337   : > { %v428_v49 = vsel %vm226_vm3, %v427_v47, -1e+30 }
 0x338   : > { %v424_v50 = vpop.f32.mrf.mxu1  ;;  %v431_v51 = vsel %vm234_vm1, %v428_v49, -inf }
 0x339   : > { %432 = vmax.xlane.f32.xlu1 %v431_v51  ;;  %v447_v51 = vld [vmem:[#allocation3 + $0x8] sm:$0xff] }
 0x33a   : > { %v1013_v52 = vpop.f32.mrf.mxu1 }
 0x33c   : > { %v570_v53 = vpop.f32.mrf.mxu1 }
 0x33d   : > { %v576_v54 = vmul.f32 0.35355338, %v570_v53 }
 0x33e   : > { %v1024_v55 = vpop.f32.mrf.mxu1 }
 0x33f   : > { %v577_v56 = vsel %vm226_vm3, %v576_v54, -1e+30 }
 0x340   : > { %v573_v57 = vpop.f32.mrf.mxu1  ;;  %v580_v58 = vsel %vm234_vm1, %v577_v56, -inf }
 0x341   : > { %581 = vmax.xlane.f32.xlu0 %v580_v58  ;;  %v359_v57 = vld [vmem:[#allocation4] sm:$0xff] }
 0x342   : > { %v1025_v59 = vpop.f32.mrf.mxu1 }
 0x344   : > { %v719_v60 = vpop.f32.mrf.mxu1 }
 0x345   : > { %v725_v61 = vmul.f32 0.35355338, %v719_v60 }
 0x346   : > { %v1036_v62 = vpop.f32.mrf.mxu1 }
 0x347   : > { %v726_v63 = vsel %vm226_vm3, %v725_v61, -1e+30 }
 0x348   : > { %v729_v1 = vsel %vm234_vm1, %v726_v63, -inf  ;;  %v722_v2 = vpop.f32.mrf.mxu1 }
 0x349   : > { %730 = vmax.xlane.f32.xlu0 %v729_v1  ;;  %v745_v2 = vld [vmem:[#allocation3 + $0x18] sm:$0xff] }
 0x34a   : > { %v1037_v3 = vpop.f32.mrf.mxu1 }
 0x3c2   : > { %v433_v5 = vpop.xlane.xlu1 %432 }
 0x3c3   : > { %v1299_v6 = vmax.f32 %v1296_v4, %v433_v5 }
 0x3c5   : > { %v435_v8 = vsub.f32 %v1296_v4, %v1299_v6  ;;  %517 = vst.msk [vmem:[#allocation2 + $0x8] sm:$0xff] %vm210_vm2, %v1299_v6  ;;  %440 = vperm.xlu0 %1087, %v1299_v6  }
 0x3c7   : > { %v436_v18 = vmul.f32 1.442695, %v435_v8 }
 0x3ca   : > { %v582_v9 = vpop.xlane.xlu0 %581 }
 0x3cb   : > { %v1309_v10 = vmax.f32 %v1306_v7, %v582_v9 }
 0x3cd   : > { %v584_v11 = vsub.f32 %v1306_v7, %v1309_v10  ;;  %666 = vst.msk [vmem:[#allocation2 + $0x10] sm:$0xff] %vm210_vm2, %v1309_v10  ;;  %589 = vperm.xlu1 %1086, %v1309_v10  }
 0x3d1   : > { %455 = vrot.lane.b32.xlu1 %v1250_v20, %s1155_s28 }
 0x3d2   : > { %v731_v13 = vpop.xlane.xlu0 %730 }
 0x3d3   : > { %v1320_v14 = vmax.f32 %v1316_v12, %v731_v13 }
 0x3d5   : > { %v733_v15 = vsub.f32 %v1316_v12, %v1320_v14  ;;  %815 = vst.msk [vmem:[#allocation2 + $0x18] sm:$0xff] %vm210_vm2, %v1320_v14  ;;  %604 = vrot.lane.b32.xlu1 %v1255_v22, %s1156_s29  ;;  %738 = vperm.xlu0 %1087, %v1320_v14  }
 0x3d7   : > { %v734_v50 = vmul.f32 1.442695, %v733_v15 }
 0x3d9   : > { %753 = vrot.lane.b32.xlu0 %v1260_v24, %s1157_s30 }
 0x3f9   : > { %304 = vadd.xlane.f32.xlu1 %v303_v17 }
 0x440   : > { %v441_v20 = vpop.permute.xlu0 %440 }
 0x441   : > { %v443_v21 = vsub.f32 %v428_v49, %v441_v20 }
 0x443   : > { %v444_v23 = vmul.f32 1.442695, %v443_v21 }
 0x445   : > { %1097 = vpow2.f32 %v444_v23 }
 0x448   : > { %v590_v25 = vpop.permute.xlu1 %589 }
 0x449   : > { %v592_v26 = vsub.f32 %v577_v56, %v590_v25  ;;  %v596_v56 = vld [vmem:[#allocation3 + $0x10] sm:$0xff] }
 0x44b   : > { %v593_v27 = vmul.f32 1.442695, %v592_v26 }
 0x44c   : > { %v456_v28 = vpop.permute.xlu1 %455 }
 0x44d   : > { %1099 = vpow2.f32 %v593_v27  ;;  %v461_v22 = vsel %vm315_vm4, %v456_v28, 0 }
 0x44e   : > { %1015 = vmatpush3.bf16.msra.mxu0 %v461_v22 }
 0x44f   : > { %1026 = vmatprep.subr.bf16.mxu0 %v1143_v0 }
 0x450   : > { %v739_v29 = vpop.permute.xlu0 %738  ;;  %v605_v24 = vpop.permute.xlu1 %604 }
 0x451   : > { %v741_v30 = vsub.f32 %v726_v63, %v739_v29  ;;  %v610_v35 = vsel %vm315_vm4, %v605_v24, 0 }
 0x452   : > { %v1098_v31 = vpop.eup %1097 }
 0x453   : > { %v742_v32 = vmul.f32 1.442695, %v741_v30  ;;  %v449_v33 = vsel %vm234_vm1, %v1098_v31, 0.0  ;;  %v454_v34 = vpack.c.bf16 %v1098_v31, %v1098_v31 }
 0x454   : > { %450 = vadd.xlane.f32.xlu0 %v449_v33  ;;  %v754_v37 = vpop.permute.xlu0 %753 }
 0x455   : > { %1101 = vpow2.f32 %v742_v32  ;;  %1017 = vmatmul.mubr.msk.bf16.vlgmr.msra.gmra.mxu0 %vm234_vm1, %v454_v34  ;;  %v759_v41 = vsel %vm315_vm4, %v754_v37, 0 }
 0x456   : > { %1027 = vmatpush3.bf16.msra.mxu0 %v610_v35  ;;  %1028 = vmatprep.mubr.msk.bf16.mxu0 %vm1144_vm0, %v1143_v0  ;;  %1103 = vpow2.f32 %v291_v36 }
 0x457   : > { %1038 = vmatprep.subr.bf16.mxu0 %v1143_v0  ;;  %1105 = vpow2.f32 %v436_v18 }
 0x45a   : > { %v1100_v38 = vpop.eup %1099 }
 0x45b   : > { %v598_v39 = vsel %vm234_vm1, %v1100_v38, 0.0  ;;  %v603_v40 = vpack.c.bf16 %v1100_v38, %v1100_v38 }
 0x45c   : > { %599 = vadd.xlane.f32.xlu1 %v598_v39 }
 0x45d   : > { %1029 = vmatmul.mubr.msk.bf16.vlgmr.msra.gmra.mxu0 %vm234_vm1, %v603_v40 }
 0x45e   : > { %1039 = vmatpush3.bf16.msra.mxu0 %v759_v41  ;;  %1040 = vmatprep.mubr.msk.bf16.mxu0 %vm1144_vm0, %v1143_v0  ;;  %v585_v0 = vmul.f32 1.442695, %v584_v11 }
 0x460   : > { %1107 = vpow2.f32 %v585_v0 }
 0x461   : > { %1109 = vpow2.f32 %v734_v50 }
 0x462   : > { %v1102_v16 = vpop.eup %1101 }
 0x463   : > { %v747_v19 = vsel %vm234_vm1, %v1102_v16, 0.0  ;;  %v752_v43 = vpack.c.bf16 %v1102_v16, %v1102_v16  ;;  %v1104_v44 = vpop.eup %1103 }
 0x464   : > { %748 = vadd.xlane.f32.xlu1 %v747_v19  ;;  %v1106_v45 = vpop.eup %1105  ;;  %v302_v47 = vmul.f32 %v1104_v44, %v301_v46 }
 0x465   : > { %1041 = vmatmul.mubr.msk.bf16.vlgmr.msra.gmra.mxu0 %vm234_vm1, %v752_v43  ;;  %v448_v52 = vmul.f32 %v1106_v45, %v447_v51 }
 0x46a   : > { %362 = vperm.xlu0 %1087, %v1104_v44  }
 0x46d   : > { %v1108_v55 = vpop.eup %1107 }
 0x46e   : > { %v597_v58 = vmul.f32 %v1108_v55, %v596_v56  ;;  %v1110_v1 = vpop.eup %1109 }
 0x46f   : > { %v746_v3 = vmul.f32 %v1110_v1, %v745_v2 }
 0x475   : > { %506 = vperm.xlu1 %1086, %v1106_v45  }
 0x482   : > { %v305_v48 = vpop.xlane.xlu1 %304 }
 0x483   : > { %v306_v49 = vadd.f32 %v305_v48, %v302_v47 }
 0x485   : > { %308 = vst.msk [vmem:[#allocation3] sm:$0xff] %vm210_vm2, %v306_v49 }
 0x48c   : > { %v820_v6 = vld [vmem:[#allocation3] sm:$0xff] }
 0x48d   : > { %1111 = vrcp.f32 %v820_v6 }
 0x49a   : > { %v1112_v15 = vpop.eup %1111 }
 0x4dd   : > { %v451_v53 = vpop.xlane.xlu0 %450 }
 0x4de   : > { %v452_v54 = vadd.f32 %v451_v53, %v448_v52 }
 0x4e0   : > { %453 = vst.msk [vmem:[#allocation3 + $0x8] sm:$0xff] %vm210_vm2, %v452_v54 }
 0x4e5   : > { %v600_v59 = vpop.xlane.xlu1 %599  ;;  %v363_v60 = vpop.permute.xlu0 %362 }
 0x4e6   : > { %v601_v61 = vadd.f32 %v600_v59, %v597_v58  ;;  %v365_v62 = vmul.f32 %v363_v60, %v359_v57 }
 0x4e7   : > { %v830_v11 = vld [vmem:[#allocation3 + $0x8] sm:$0xff] }
 0x4e8   : > { %602 = vst.msk [vmem:[#allocation3 + $0x10] sm:$0xff] %vm210_vm2, %v601_v61  ;;  %v366_v63 = vadd.f32 %v365_v62, %v1285_v42 }
 0x4ea   : > { %367 = vst.msk [vmem:[#allocation4] sm:$0xff] %vm234_vm1, %v366_v63 }
 0x4ed   : > { %v749_v4 = vpop.xlane.xlu1 %748 }
 0x4ee   : > { %v750_v5 = vadd.f32 %v749_v4, %v746_v3 }
 0x4ef   : > { %v840_v7 = vld [vmem:[#allocation3 + $0x10] sm:$0xff] }
 0x4f0   : > { %751 = vst.msk [vmem:[#allocation3 + $0x18] sm:$0xff] %vm210_vm2, %v750_v5  ;;  %1113 = vrcp.f32 %v840_v7 }
 0x4f1   : > { %1115 = vrcp.f32 %v830_v11  ;;  %v507_v29 = vpop.permute.xlu1 %506  ;;  %v503_v24 = vld [vmem:[#allocation4] sm:$0xff] }
 0x4f2   : > { %v509_v30 = vmul.f32 %v507_v29, %v503_v24 }
 0x4f7   : > { %v850_v13 = vld [vmem:[#allocation3 + $0x18] sm:$0xff] }
 0x4f8   : > { %1117 = vrcp.f32 %v850_v13 }
 0x4fd   : > { %v1114_v21 = vpop.eup %1113 }
 0x4fe   : > { %v1116_v26 = vpop.eup %1115 }
 0x505   : > { %v1118_v22 = vpop.eup %1117 }
 0x515   : > { %v497_v8 = vpop.f32.mrf.mxu0 }
 0x516   : > { %511 = vrot.lane.b32.xlu0 %v497_v8, %s1158_s3 }
 0x517   : > { %v1018_v9 = vpop.f32.mrf.mxu0 }
 0x519   : > { %v500_v10 = vpop.f32.mrf.mxu0 }
 0x51a   : > { %655 = vperm.xlu0 %1087, %v1108_v55  }
 0x51b   : > { %v1019_v42 = vpop.f32.mrf.mxu0 }
 0x51d   : > { %v646_v12 = vpop.f32.mrf.mxu0 }
 0x51e   : > { %804 = vperm.xlu0 %1087, %v1110_v1   ;;  %660 = vrot.lane.b32.xlu1 %v646_v12, %s1159_s4 }
 0x51f   : > { %v1030_v14 = vpop.f32.mrf.mxu0 }
 0x521   : > { %v649_v17 = vpop.f32.mrf.mxu0 }
 0x522   : > { %824 = vperm.xlu0 %1087, %v1112_v15  }
 0x523   : > { %v1031_v20 = vpop.f32.mrf.mxu0 }
 0x525   : > { %v795_v23 = vpop.f32.mrf.mxu0 }
 0x526   : > { %844 = vperm.xlu0 %1087, %v1114_v21   ;;  %809 = vrot.lane.b32.xlu1 %v795_v23, %s1160_s5 }
 0x527   : > { %v1042_v25 = vpop.f32.mrf.mxu0 }
 0x529   : > { %v798_v27 = vpop.f32.mrf.mxu0 }
 0x52a   : > { %834 = vperm.xlu1 %1086, %v1116_v26  }
 0x52b   : > { %v1043_v28 = vpop.f32.mrf.mxu0 }
 0x52e   : > { %854 = vperm.xlu1 %1086, %v1118_v22  }
 0x588   : > { %v512_v31 = vpop.permute.xlu0 %511 }
 0x589   : > { %v514_v32 = vadd.f32 %v512_v31, %v509_v30 }
 0x58b   : > { %516 = vst.msk [vmem:[#allocation4] sm:$0xff] %vm515_vm6, %v514_v32 }
 0x590   : > { %v661_v36 = vpop.permute.xlu1 %660 }
 0x592   : > { %v652_v33 = vld [vmem:[#allocation4] sm:$0xff] }
 0x595   : > { %v656_v34 = vpop.permute.xlu0 %655 }
 0x596   : > { %v658_v35 = vmul.f32 %v656_v34, %v652_v33 }
 0x598   : > { %v663_v37 = vadd.f32 %v661_v36, %v658_v35  ;;  %v810_v41 = vpop.permute.xlu1 %809 }
 0x599   : > { %v805_v38 = vpop.permute.xlu0 %804 }
 0x59a   : > { %665 = vst.msk [vmem:[#allocation4] sm:$0xff] %vm664_vm7, %v663_v37 }
 0x59d   : > { %v825_v18 = vpop.permute.xlu0 %824 }
 0x5a1   : > { %v801_v39 = vld [vmem:[#allocation4] sm:$0xff]  ;;  %v845_v47 = vpop.permute.xlu0 %844 }
 0x5a2   : > { %v807_v40 = vmul.f32 %v805_v38, %v801_v39 }
 0x5a4   : > { %v812_v16 = vadd.f32 %v810_v41, %v807_v40 }
 0x5a5   : > { %v835_v45 = vpop.permute.xlu1 %834 }
 0x5a6   : > { %814 = vst.msk [vmem:[#allocation4] sm:$0xff] %vm813_vm8, %v812_v16 }
 0x5a9   : > { %v855_v50 = vpop.permute.xlu1 %854 }
 0x5ad   : > { %v819_v19 = vld [vmem:[#allocation4] sm:$0xff] }
 0x5ae   : > { %v827_v43 = vmul.f32 %v825_v18, %v819_v19 }
 0x5b0   : > { %828 = vst.msk [vmem:[#allocation4] sm:$0xff] %vm234_vm1, %v827_v43 }
 0x5b7   : > { %v829_v44 = vld [vmem:[#allocation4] sm:$0xff] }
 0x5b8   : > { %v837_v46 = vmul.f32 %v835_v45, %v829_v44 }
 0x5ba   : > { %838 = vst.msk [vmem:[#allocation4] sm:$0xff] %vm515_vm6, %v837_v46 }
 0x5c1   : > { %v839_v48 = vld [vmem:[#allocation4] sm:$0xff] }
 0x5c2   : > { %v847_v49 = vmul.f32 %v845_v47, %v839_v48 }
 0x5c4   : > { %848 = vst.msk [vmem:[#allocation4] sm:$0xff] %vm664_vm7, %v847_v49 }
 0x5cb   : > { %v849_v0 = vld [vmem:[#allocation4] sm:$0xff] }
 0x5cc   : > { %v857_v51 = vmul.f32 %v855_v50, %v849_v0 }
 0x5ce   : > { %858 = vst.msk [vmem:[#allocation4] sm:$0xff] %vm813_vm8, %v857_v51 }
 0x5d5   : > { %v859_v52 = vld [vmem:[#allocation4] sm:$0xff] }
 0x5d6   : > { %v860_v53 = vpack.c.bf16 %v859_v52, %v859_v52 }
 0x5d8   : > { %862 = vst.msk [vmem:[%s204_s8] sm:$0xf] %vm861_vm9, %v860_v53 }
 0x5d9 PF: > { %s12_s11 = sadd.s32 1, %s1141_s11   ;;  %s1385_s9 = smov %s1137_s10 }
 0x5da   : > { %p9_p5 = scmp.ge.s32.totalorder %s12_s11, 4   ;;  %s1386_s10 = smov %s1388_s12 }
 0x5dc   :  { %11 = sbr.rel (!%p9_p5) target bundleno = 2 (0x2), region = 75 }

// kernel: forward_features.17
= control target key start
LH: loop header
LB: loop body
LE: loop exit
PB: predicated region body
PF: predicated region fallthrough
CT: control target
= control target key end

     0   :  { %v230_v0 = vmov 0.0   ;;  %vm231_vm0 = vmmov 0   ;;  %vm164_vm1 = vcmask 257024   ;;  %s304_s1 = inlined_call_operand.vmem [shape: bf16[128,32], index: 1, kind: input, shape index: {}]   ;;  %s305_s0 = inlined_call_operand.vmem [shape: bf16[16,128], index: 0, kind: input, shape index: {}]   ;;  %s306_s2 = inlined_call_operand.vmem [shape: f32[1,32], index: 2, kind: input, shape index: {}]   ;;  %s307_s4 = inlined_call_operand.vmem [shape: bf16[16,32], index: 4, kind: input, shape index: {}]   ;;  %s308_s3 = inlined_call_operand.vmem [shape: f32[1,32], index: 3, kind: input, shape index: {}]   ;;  %s309_s5 = inlined_call_operand.vmem [shape: bf16[16,32], index: 5, kind: output, shape index: {}]  }
   0x1   :  { %199 = vmatprep.subr.bf16.mxu0 %v230_v0  ;;  %v221_v1 = vld [vmem:[%s304_s1 + $0x38] sm:$0xff]   ;;  %215 = vmatprep.mubr.msk.bf16.mxu0 %vm231_vm0, %v230_v0  ;;  %v222_v2 = vld [vmem:[%s304_s1 + $0x30] sm:$0xff]   ;;  %v223_v3 = vld [vmem:[%s304_s1 + $0x28] sm:$0xff]  }
   0x2   :  { %200 = vmatpush3.bf16.msra.mxu0 %v221_v1  ;;  %v224_v4 = vld [vmem:[%s304_s1 + $0x20] sm:$0xff]   ;;  %v225_v5 = vld [vmem:[%s304_s1 + $0x18] sm:$0xff]   ;;  %v226_v6 = vld [vmem:[%s304_s1 + $0x10] sm:$0xff]  }
   0x3   :  { %201 = vmatprep.subr.bf16.mxu0 %v230_v0  ;;  %v227_v7 = vld [vmem:[%s304_s1 + $0x8] sm:$0xff]   ;;  %v228_v8 = vld [vmem:[%s304_s1] sm:$0xff]  }
   0x4   :  { %v229_v9 = vld [vmem:[%s305_s0] sm:$0xff]  }
   0x5   :  { %v171_v10 = vld [vmem:[%s306_s2] ss:$0 sm:$0xff] }
   0x6   :  { %202 = vmatpush3.bf16.msra.mxu0 %v222_v2  ;;  %v187_v11 = vld [vmem:[%s307_s4] sm:$0xff]  }
   0x7   :  { %203 = vmatprep.subr.bf16.mxu0 %v230_v0  ;;  %v181_v13 = vld [vmem:[%s308_s3] ss:$0 sm:$0xff]  ;;  %v188_v15 = vunpack.c.l.bf16 %v187_v11  ;;  %v189_v21 = vunpack.c.h.bf16 %v187_v11 }
   0xa   :  { %204 = vmatpush3.bf16.msra.mxu0 %v223_v3 }
   0xb   :  { %205 = vmatprep.subr.bf16.mxu0 %v230_v0 }
   0xe   :  { %206 = vmatpush3.bf16.msra.mxu0 %v224_v4 }
   0xf   :  { %207 = vmatprep.subr.bf16.mxu0 %v230_v0 }
  0x12   :  { %208 = vmatpush3.bf16.msra.mxu0 %v225_v5 }
  0x13   :  { %209 = vmatprep.subr.bf16.mxu0 %v230_v0 }
  0x16   :  { %210 = vmatpush3.bf16.msra.mxu0 %v226_v6 }
  0x17   :  { %211 = vmatprep.subr.bf16.mxu0 %v230_v0 }
  0x1a   :  { %212 = vmatpush3.bf16.msra.mxu0 %v227_v7 }
  0x1b   :  { %213 = vmatprep.subr.bf16.mxu0 %v230_v0 }
  0x1e   :  { %214 = vmatpush3.bf16.msra.mxu0 %v228_v8 }
  0x21   :  { %216 = vmatmul.mubr.bf16.vlgmr.msra.gmra.mxu0 %v229_v9 }
  0xe1   :  { %v134_v12 = vpop.f32.mrf.mxu0 }
  0xe2   :  { %v135_v14 = vadd.f32 %v171_v10, %v134_v12 }
  0xe3   :  { %v217_v16 = vpop.f32.mrf.mxu0 }
  0xe4   :  { %v148_v17 = vmul.f32 %v181_v13, %v135_v14 }
  0xe5   :  { %v137_v18 = vpop.f32.mrf.mxu0 }
  0xe6   :  { %v154_v19 = vadd.f32 %v188_v15, %v148_v17  ;;  %v138_v20 = vadd.f32 %v171_v10, %v137_v18 }
  0xe7   :  { %v218_v22 = vpop.f32.mrf.mxu0 }
  0xe8   :  { %v184_v23 = vpack.c.bf16 %v154_v19, %v154_v19  ;;  %v149_v24 = vmul.f32 %v181_v13, %v138_v20 }
  0xea   :  { %165 = vst.msk [vmem:[%s309_s5] sm:$0xf] %vm164_vm1, %v184_v23  ;;  %v155_v25 = vadd.f32 %v189_v21, %v149_v24 }
  0xec   :  { %v185_v26 = vpack.c.bf16 %v155_v25, %v155_v25 }
  0xee   :  { %166 = vst.msk [vmem:[%s309_s5 + $0x4] sm:$0xf] %vm164_vm1, %v185_v26 }

// kernel: forward_features.16
= control target key start
LH: loop header
LB: loop body
LE: loop exit
PB: predicated region body
PF: predicated region fallthrough
CT: control target
= control target key end

     0   :  { %vm29_vm0 = vcmask 261120   ;;  %v233_v16 = vmov 0.0   ;;  %vm234_vm1 = vmmov 0   ;;  %vm83_vm2 = vcmask 257024   ;;  %s291_s0 = inlined_call_operand.vmem [shape: bf16[16,32], index: 0, kind: input, shape index: {}]   ;;  %s292_s1 = inlined_call_operand.vmem [shape: bf16[32,128], index: 1, kind: input, shape index: {}]   ;;  %s293_s3 = inlined_call_operand.vmem [shape: f32[1,32], index: 3, kind: input, shape index: {}]   ;;  %s294_s4 = inlined_call_operand.vmem [shape: f32[1,32], index: 4, kind: input, shape index: {}]   ;;  %s295_s2 = inlined_call_operand.vmem [shape: f32[1,128], index: 2, kind: input, shape index: {}]   ;;  %s296_s5 = inlined_call_operand.vmem [shape: bf16[16,128], index: 5, kind: output, shape index: {}]  }
   0x1   :  { %v201_v0 = vld [vmem:[%s291_s0] sm:$0xff]   ;;  %v222_v15 = vld [vmem:[%s292_s1 + $0x8] sm:$0xff]   ;;  %212 = vmatprep.subr.bf16.mxu0 %v233_v16  ;;  %216 = vmatprep.mubr.msk.bf16.mxu0 %vm234_vm1, %v233_v16 }
   0x2   :  { %v202_v1 = vunpack.c.l.bf16 %v201_v0  ;;  %v203_v2 = vunpack.c.h.bf16 %v201_v0  ;;  %213 = vmatpush3.bf16.msra.mxu0 %v222_v15  ;;  %v223_v17 = vld [vmem:[%s292_s1] sm:$0xff]  }
   0x3   :  { %214 = vmatprep.subr.bf16.mxu0 %v233_v16  ;;  %v185_v25 = vld [vmem:[%s293_s3] ss:$0 sm:$0xff] }
   0x4   :  { %v30_v3 = vsel %vm29_vm0, %v202_v1, 0.0  ;;  %v33_v4 = vsel %vm29_vm0, %v203_v2, 0.0  ;;  %v186_v27 = vld [vmem:[%s294_s4] ss:$0 sm:$0xff] }
   0x5   :  { %31 = vadd.xlane.f32.xlu0 %v30_v3  ;;  %v189_v37 = vld [vmem:[%s295_s2] ss:$0 sm:$0xff] }
   0x6   :  { %215 = vmatpush3.bf16.msra.mxu0 %v223_v17 }
   0x9   :  { %34 = vadd.xlane.f32.xlu0 %v33_v4 }
  0x8e   :  { %v32_v5 = vpop.xlane.xlu0 %31 }
  0x8f   :  { %v37_v6 = vmul.f32 0.03125, %v32_v5 }
  0x91   :  { %v39_v7 = vsub.f32 %v202_v1, %v37_v6 }
  0x92   :  { %v35_v8 = vpop.xlane.xlu0 %34 }
  0x93   :  { %v38_v9 = vmul.f32 0.03125, %v35_v8  ;;  %v41_v10 = vmul.f32 %v39_v7, %v39_v7 }
  0x95   :  { %v40_v11 = vsub.f32 %v203_v2, %v38_v9  ;;  %v43_v12 = vsel %vm29_vm0, %v41_v10, 0.0 }
  0x96   :  { %44 = vadd.xlane.f32.xlu1 %v43_v12 }
  0x97   :  { %v42_v13 = vmul.f32 %v40_v11, %v40_v11 }
  0x99   :  { %v46_v14 = vsel %vm29_vm0, %v42_v13, 0.0 }
  0x9a   :  { %47 = vadd.xlane.f32.xlu1 %v46_v14 }
 0x11f   :  { %v45_v18 = vpop.xlane.xlu1 %44 }
 0x120   :  { %v49_v19 = vmul.f32 0.03125, %v45_v18 }
 0x122   :  { %v51_v20 = vadd.f32 1e-06, %v49_v19 }
 0x123   :  { %v48_v21 = vpop.xlane.xlu1 %47 }
 0x124   :  { %225 = vrsqrt.f32 %v51_v20  ;;  %v50_v22 = vmul.f32 0.03125, %v48_v21 }
 0x126   :  { %v52_v23 = vadd.f32 1e-06, %v50_v22 }
 0x128   :  { %227 = vrsqrt.f32 %v52_v23 }
 0x131   :  { %v226_v24 = vpop.eup %225 }
 0x132   :  { %v55_v26 = vmul.f32 %v226_v24, %v39_v7 }
 0x134   :  { %v64_v28 = vmul.f32 %v185_v25, %v55_v26 }
 0x135   :  { %v228_v29 = vpop.eup %227 }
 0x136   :  { %v73_v30 = vadd.f32 %v186_v27, %v64_v28  ;;  %v56_v31 = vmul.f32 %v228_v29, %v40_v11 }
 0x138   :  { %v196_v32 = vpack.c.bf16 %v73_v30, %v73_v30  ;;  %v65_v33 = vmul.f32 %v185_v25, %v56_v31 }
 0x13a   :  { %84 = vst.msk [vmem:[#allocation2] sm:$0xf] %vm83_vm2, %v196_v32  ;;  %v74_v34 = vadd.f32 %v186_v27, %v65_v33 }
 0x13c   :  { %v197_v35 = vpack.c.bf16 %v74_v34, %v74_v34 }
 0x13e   :  { %85 = vst.msk [vmem:[#allocation2 + $0x4] sm:$0xf] %vm83_vm2, %v197_v35 }
 0x145   :  { %v224_v36 = vld [vmem:[#allocation2] sm:$0xff]  }
 0x146   :  { %217 = vmatmul.mubr.msk.bf16.vlgmr.msra.gmra.mxu0 %vm29_vm0, %v224_v36 }
 0x206   :  { %v154_v38 = vpop.f32.mrf.mxu0 }
 0x207   :  { %v155_v39 = vadd.f32 %v189_v37, %v154_v38 }
 0x208   :  { %v218_v40 = vpop.f32.mrf.mxu0 }
 0x209   :  { %v163_v41 = vmul.f32 0.70710677, %v155_v39  ;;  %v161_v49 = vmul.f32 0.5, %v155_v39 }
 0x20a   :  { %v157_v42 = vpop.f32.mrf.mxu0 }
 0x20b   :  { %229 = verf.f32 %v163_v41  ;;  %v158_v43 = vadd.f32 %v189_v37, %v157_v42 }
 0x20c   :  { %v219_v44 = vpop.f32.mrf.mxu0 }
 0x20d   :  { %v164_v45 = vmul.f32 0.70710677, %v158_v43  ;;  %v162_v50 = vmul.f32 0.5, %v158_v43 }
 0x20f   :  { %231 = verf.f32 %v164_v45 }
 0x218   :  { %v230_v46 = vpop.eup %229 }
 0x219   :  { %v167_v47 = vadd.f32 1.0, %v230_v46 }
 0x21b   :  { %v169_v52 = vmul.f32 %v167_v47, %v161_v49 }
 0x21c   :  { %v232_v48 = vpop.eup %231 }
 0x21d   :  { %v168_v51 = vadd.f32 1.0, %v232_v48 }
 0x21f   :  { %v170_v53 = vmul.f32 %v168_v51, %v162_v50 }
 0x221   :  { %v207_v54 = vpack.c.bf16 %v170_v53, %v169_v52 }
 0x223   :  { %208 = vst [vmem:[%s296_s5] sm:$0xff] %v207_v54  }

// kernel: forward_features.23
= control target key start
LH: loop header
LB: loop body
LE: loop exit
PB: predicated region body
PF: predicated region fallthrough
CT: control target
= control target key end

     0   :  { %vm18_vm0 = vcmask 261120   ;;  %s121_s0 = inlined_call_operand.vmem [shape: bf16[16,32], index: 0, kind: input, shape index: {}]   ;;  %s122_s1 = inlined_call_operand.vmem [shape: f32[1,32], index: 1, kind: input, shape index: {}]   ;;  %s123_s2 = inlined_call_operand.vmem [shape: f32[1,32], index: 2, kind: input, shape index: {}]   ;;  %s124_s3 = inlined_call_operand.vmem [shape: f32[16,32], index: 3, kind: output, shape index: {}]  }
   0x1   :  { %v73_v0 = vld [vmem:[%s121_s0] sm:$0xff]  }
   0x2   :  { %v74_v1 = vunpack.c.l.bf16 %v73_v0  ;;  %v75_v2 = vunpack.c.h.bf16 %v73_v0  ;;  %v70_v22 = vld [vmem:[%s122_s1] ss:$0 sm:$0xff] }
   0x3   :  { %v71_v24 = vld [vmem:[%s123_s2] ss:$0 sm:$0xff] }
   0x4   :  { %v19_v3 = vsel %vm18_vm0, %v74_v1, 0.0  ;;  %v22_v4 = vsel %vm18_vm0, %v75_v2, 0.0 }
   0x5   :  { %20 = vadd.xlane.f32.xlu0 %v19_v3 }
   0x9   :  { %23 = vadd.xlane.f32.xlu0 %v22_v4 }
  0x8e   :  { %v21_v5 = vpop.xlane.xlu0 %20 }
  0x8f   :  { %v26_v6 = vmul.f32 0.03125, %v21_v5 }
  0x91   :  { %v28_v7 = vsub.f32 %v74_v1, %v26_v6 }
  0x92   :  { %v24_v8 = vpop.xlane.xlu0 %23 }
  0x93   :  { %v27_v9 = vmul.f32 0.03125, %v24_v8  ;;  %v30_v10 = vmul.f32 %v28_v7, %v28_v7 }
  0x95   :  { %v29_v11 = vsub.f32 %v75_v2, %v27_v9  ;;  %v32_v12 = vsel %vm18_vm0, %v30_v10, 0.0 }
  0x96   :  { %33 = vadd.xlane.f32.xlu1 %v32_v12 }
  0x97   :  { %v31_v13 = vmul.f32 %v29_v11, %v29_v11 }
  0x99   :  { %v35_v14 = vsel %vm18_vm0, %v31_v13, 0.0 }
  0x9a   :  { %36 = vadd.xlane.f32.xlu1 %v35_v14 }
 0x11f   :  { %v34_v15 = vpop.xlane.xlu1 %33 }
 0x120   :  { %v38_v16 = vmul.f32 0.03125, %v34_v15 }
 0x122   :  { %v40_v17 = vadd.f32 1e-06, %v38_v16 }
 0x123   :  { %v37_v18 = vpop.xlane.xlu1 %36 }
 0x124   :  { %76 = vrsqrt.f32 %v40_v17  ;;  %v39_v19 = vmul.f32 0.03125, %v37_v18 }
 0x126   :  { %v41_v20 = vadd.f32 1e-06, %v39_v19 }
 0x128   :  { %78 = vrsqrt.f32 %v41_v20 }
 0x131   :  { %v77_v21 = vpop.eup %76 }
 0x132   :  { %v44_v23 = vmul.f32 %v77_v21, %v28_v7 }
 0x134   :  { %v53_v25 = vmul.f32 %v70_v22, %v44_v23 }
 0x135   :  { %v79_v26 = vpop.eup %78 }
 0x136   :  { %v62_v27 = vadd.f32 %v71_v24, %v53_v25  ;;  %v45_v28 = vmul.f32 %v79_v26, %v29_v11 }
 0x138   :  { %64 = vst.msk [vmem:[%s124_s3] sm:$0xff] %vm18_vm0, %v62_v27  ;;  %v54_v29 = vmul.f32 %v70_v22, %v45_v28 }
 0x13a   :  { %v63_v30 = vadd.f32 %v71_v24, %v54_v29 }
 0x13c   :  { %65 = vst.msk [vmem:[%s124_s3 + $0x8] sm:$0xff] %vm18_vm0, %v63_v30 }

</bundles_post_ra>
